<compile_context>
chip_gen: v5e
topology: v5e:2x2
jax: 0.10.0
libtpu: 0.0.40
codegen_flags: <defaults>
</compile_context>

<pallas_src>
from functools import partial

import numpy as np
import jax
import jax.numpy as jnp
from jax.experimental import pallas as pl
from jax.experimental.pallas import tpu as pltpu


def _crop_indices(h, w, kh, kw):
    """Faithful port of the index computation in ImageCrops.forward."""
    h_div = h / kh
    w_div = w / kw
    h_diff = h - kh
    w_diff = w - kw
    kh_h_div_diff = int((h - kh * int(h_div)) / 2)
    kw_w_div_diff = int((w - kw * int(w_div)) / 2)
    mid_h_start, mid_h_end = kh_h_div_diff, h - kh_h_div_diff - kh
    mid_w_start, mid_w_end = kw_w_div_diff, w - kw_w_div_diff - kw
    if mid_h_start == 0 and mid_h_end == h - kh:
        mid_h_start, mid_h_end = kh, h - kh
    if mid_w_start == 0 and mid_w_end == w - kw:
        mid_w_start, mid_w_end = kw, w - kw
    step_h = max(1, int(kh / 2))
    step_w = max(1, int(kw / 2))
    mid_h = list(range(mid_h_start, mid_h_end + 1, step_h))
    mid_w = list(range(mid_w_start, mid_w_end + 1, step_w))
    # torch.unique sorts its result, so sorted(set(...)) matches.
    h_indicies = sorted(set([0] + mid_h + [h_diff]))
    w_indicies = sorted(set([0] + mid_w + [w_diff]))
    return h_indicies, w_indicies


def _image_crops_kernel(x_ref, y_ref, ox_ref, oy_ref, *, offsets, kh, kw):
    # x_ref / y_ref : (pb, H, W)       VMEM-resident planes (one DMA per plane)
    # ox_ref/oy_ref : (K, pb, kh*kw)   flattened crops, already in the final
    #                                  (possibly shuffled) memory layout
    # All offsets are compile-time constants -> static slices, fully unrolled.
    # TODO(synk): for very large K (hundreds of crops) switch to lax.fori_loop
    # over h-offsets with an SMEM offset table to bound code size / live ranges.
    by_v = {}
    for k, (v, u) in enumerate(offsets):
        by_v.setdefault(v, []).append((k, u))

    def flatten(crop):
        # (pb, kh, kw) -> (pb, kh*kw): lane-dense concat of the kh crop rows.
        return jnp.concatenate([crop[:, r, :] for r in range(kh)], axis=-1)

    for v, items in by_v.items():
        band_x = x_ref[:, v:v + kh, :]   # hoisted sublane slice, once per band
        band_y = y_ref[:, v:v + kh, :]
        for k, u in items:
            ox_ref[k] = flatten(band_x[:, :, u:u + kw])
            oy_ref[k] = flatten(band_y[:, :, u:u + kw])


def _vmem_capacity_bytes():
    try:
        info = pltpu.get_tpu_info()
        cap = getattr(info, "vmem_capacity_bytes", None)
        if cap:
            return int(cap)
    except Exception:
        pass
    return 64 * 1024 * 1024  # conservative default (v7x per-TC VMEM)


def image_crops(x, y, kh, kw, *, shuffle=True, key=None, verbose=False):
    """JAX/Pallas equivalent of ImageCrops(kh, kw, shuffle).forward((x, y)).

    Returns (crops_x, crops_y), each of shape (K, N, C, kh, kw) where K is the
    number of crop windows (stacked instead of a Python list of tensors).
    """
    N, C, H, W = x.shape
    Ny, Cy, Hy, Wy = y.shape
    if verbose:
        print(f"ImageCrops x/y shapes: {x.shape}/{y.shape}\n")
    # The module slices both x and y with the same (h, w) indices; the kernel
    # requires matching shapes so the shared windows are always in bounds
    # (Pallas does no runtime bounds checking on VMEM refs).
    assert (N, C, H, W) == (Ny, Cy, Hy, Wy), "x and y must have matching NCHW shapes"

    # h comes from x.shape[2], w from y.shape[3] -- exactly as in the module.
    h_idx, w_idx = _crop_indices(H, Wy, kh, kw)
    if verbose:
        print(f"h_indicies:\n{h_idx}\nw_indicies:\n{w_idx}\n")
    offsets_rm = [(int(v), int(u)) for v in h_idx for u in w_idx]
    K = len(offsets_rm)

    # Fold the shuffle into the kernel: permute the static offsets at trace
    # time when the key is concrete (no post-hoc gather / second HBM pass).
    post_perm = None
    offsets = tuple(offsets_rm)
    if shuffle:
        if key is None:
            # TODO(synk): the torch module uses fresh randomness on every call.
            key = jax.random.PRNGKey(0)
        perm = jax.random.permutation(key, K)
        try:
            perm_host = np.asarray(jax.device_get(perm)).tolist()
            offsets = tuple(offsets_rm[int(p)] for p in perm_host)
        except Exception:
            post_perm = perm  # traced key (e.g. under jit): fall back to gather

    NC = N * C
    khkw = kh * kw
    xf = x.reshape(NC, H, W)
    yf = y.reshape(NC, H, W)

    # ---- generation-aware block sizing -----------------------------------
    itemsize = max(x.dtype.itemsize, y.dtype.itemsize)
    # per-plane VMEM: x plane + y plane + K x-crops + K y-crops
    plane_bytes = (2 * H * W + 2 * K * khkw) * itemsize
    vmem_cap = _vmem_capacity_bytes()
    budget = min((vmem_cap * 5) // 8, 56 << 20)   # double-buffered user blocks

    if NC <= 8:
        pb = NC                    # output block 2nd-minor dim == full NC dim
    else:
        # multiples of 8 so the output block's second-minor dim is sublane-aligned
        pb_cap = max(8, (min(NC, budget // (2 * plane_bytes)) // 8) * 8)
        target = max(8, ((pl.cdiv(NC, 4) + 7) // 8) * 8)   # aim for ~4 grid steps
        pb = min(pb_cap, target)
        steps = pl.cdiv(NC, pb)
        if steps > 1 and steps % 2 == 1:   # prefer even step count (v7x: 2 TCs)
            for cand in range(pb, 7, -8):
                if pl.cdiv(NC, cand) % 2 == 0:
                    pb = cand
                    break
    grid = (pl.cdiv(NC, pb),)
    # TODO(synk): add a band-tiling fallback along W when even one plane's
    # K-crop working set exceeds the VMEM budget (very large images).
    ws = 2 * pb * plane_bytes                        # double-buffered working set
    vmem_limit = int(min(max(ws + (8 << 20), 32 << 20),
                         max(vmem_cap - (8 << 20), 16 << 20)))

    kernel = partial(_image_crops_kernel, offsets=offsets, kh=kh, kw=kw)

    bytes_accessed = (NC * H * W + K * NC * khkw) * (x.dtype.itemsize + y.dtype.itemsize)

    out_x, out_y = pl.pallas_call(
        kernel,
        out_shape=(jax.ShapeDtypeStruct((K, NC, khkw), x.dtype),
                   jax.ShapeDtypeStruct((K, NC, khkw), y.dtype)),
        grid=grid,
        in_specs=[pl.BlockSpec((pb, H, W), lambda i: (i, 0, 0)),
                  pl.BlockSpec((pb, H, W), lambda i: (i, 0, 0))],
        out_specs=(pl.BlockSpec((K, pb, khkw), lambda i: (0, i, 0)),
                   pl.BlockSpec((K, pb, khkw), lambda i: (0, i, 0))),
        compiler_params=pltpu.CompilerParams(
            dimension_semantics=("parallel",),
            vmem_limit_bytes=vmem_limit),
        cost_estimate=pl.CostEstimate(flops=0, transcendentals=0,
                                      bytes_accessed=bytes_accessed),
    )(xf, yf)

    # Free metadata reshape: (K, NC, kh*kw) has the exact memory layout of
    # (K, N, C, kh, kw).
    crops_x = out_x.reshape(K, N, C, kh, kw)
    crops_y = out_y.reshape(K, N, C, kh, kw)

    if post_perm is not None:
        crops_x = jnp.take(crops_x, post_perm, axis=0)
        crops_y = jnp.take(crops_y, post_perm, axis=0)

    return crops_x, crops_y


if __name__ == "__main__":
    key = jax.random.PRNGKey(0)
    kx, ky, ks = jax.random.split(key, 3)

    N, C, H, W = 2, 4, 16, 16
    kh, kw = 8, 8

    x = jax.random.normal(kx, (N, C, H, W), dtype=jnp.float32)
    y = jax.random.normal(ky, (N, C, H, W), dtype=jnp.float32)

    # Deterministic order first (shuffle=False) for the reference check.
    cx, cy = image_crops(x, y, kh, kw, shuffle=False)
    jax.block_until_ready((cx, cy))

    h_idx, w_idx = _crop_indices(H, W, kh, kw)
    ref_x = jnp.stack([x[:, :, v:v + kh, u:u + kw] for v in h_idx for u in w_idx])
    ref_y = jnp.stack([y[:, :, v:v + kh, u:u + kw] for v in h_idx for u in w_idx])

    assert cx.shape == ref_x.shape and cy.shape == ref_y.shape
    assert jnp.allclose(cx, ref_x) and jnp.allclose(cy, ref_y)

    # Shuffled path (module default): same crops, permuted identically for x/y.
    cxs, cys = image_crops(x, y, kh, kw, shuffle=True, key=ks)
    jax.block_until_ready((cxs, cys))
    perm = jnp.asarray(np.asarray(jax.random.permutation(ks, ref_x.shape[0])))
    assert jnp.allclose(cxs, jnp.take(ref_x, perm, axis=0))
    assert jnp.allclose(cys, jnp.take(ref_y, perm, axis=0))

    print("KERNEL_OK")
</pallas_src>

<mosaic_0001>
module attributes {stable_mosaic.version = 11 : i64} {
  func.func @_image_crops_kernel(%arg0: i32, %arg1: memref<8x16x16xf32, #tpu.memory_space<vmem>>, %arg2: memref<8x16x16xf32, #tpu.memory_space<vmem>>, %arg3: memref<4x8x64xf32, #tpu.memory_space<vmem>>, %arg4: memref<4x8x64xf32, #tpu.memory_space<vmem>>) attributes {dimension_semantics = [#tpu.dimension_semantics<parallel>], iteration_bounds = array<i64: 1>, scalar_prefetch = 0 : i64, scratch_operands = 0 : i64, tpu.core_type = #tpu.core_type<tc>, window_params = [{transform_indices = @transform_0, window_bounds = array<i64: 8, 16, 16>}, {transform_indices = @transform_1, window_bounds = array<i64: 8, 16, 16>}, {transform_indices = @transform_2, window_bounds = array<i64: 4, 8, 64>}, {transform_indices = @transform_3, window_bounds = array<i64: 4, 8, 64>}]} {
    %c0 = arith.constant 0 : index
    %c0_0 = arith.constant 0 : index
    %c0_1 = arith.constant 0 : index
    %0 = vector.load %arg1[%c0, %c0_0, %c0_1] : memref<8x16x16xf32, #tpu.memory_space<vmem>>, vector<8x8x16xf32>
    %c0_2 = arith.constant 0 : index
    %c0_3 = arith.constant 0 : index
    %c0_4 = arith.constant 0 : index
    %1 = vector.load %arg2[%c0_2, %c0_3, %c0_4] : memref<8x16x16xf32, #tpu.memory_space<vmem>>, vector<8x8x16xf32>
    %2 = vector.extract_strided_slice %0 {offsets = [0, 0, 0], sizes = [8, 8, 8], strides = [1, 1, 1]} : vector<8x8x16xf32> to vector<8x8x8xf32>
    %3 = vector.extract_strided_slice %2 {offsets = [0, 0, 0], sizes = [8, 1, 8], strides = [1, 1, 1]} : vector<8x8x8xf32> to vector<8x1x8xf32>
    %4 = vector.shape_cast %3 : vector<8x1x8xf32> to vector<8x8xf32>
    %5 = vector.extract_strided_slice %2 {offsets = [0, 1, 0], sizes = [8, 1, 8], strides = [1, 1, 1]} : vector<8x8x8xf32> to vector<8x1x8xf32>
    %6 = vector.shape_cast %5 : vector<8x1x8xf32> to vector<8x8xf32>
    %7 = vector.extract_strided_slice %2 {offsets = [0, 2, 0], sizes = [8, 1, 8], strides = [1, 1, 1]} : vector<8x8x8xf32> to vector<8x1x8xf32>
    %8 = vector.shape_cast %7 : vector<8x1x8xf32> to vector<8x8xf32>
    %9 = vector.extract_strided_slice %2 {offsets = [0, 3, 0], sizes = [8, 1, 8], strides = [1, 1, 1]} : vector<8x8x8xf32> to vector<8x1x8xf32>
    %10 = vector.shape_cast %9 : vector<8x1x8xf32> to vector<8x8xf32>
    %11 = vector.extract_strided_slice %2 {offsets = [0, 4, 0], sizes = [8, 1, 8], strides = [1, 1, 1]} : vector<8x8x8xf32> to vector<8x1x8xf32>
    %12 = vector.shape_cast %11 : vector<8x1x8xf32> to vector<8x8xf32>
    %13 = vector.extract_strided_slice %2 {offsets = [0, 5, 0], sizes = [8, 1, 8], strides = [1, 1, 1]} : vector<8x8x8xf32> to vector<8x1x8xf32>
    %14 = vector.shape_cast %13 : vector<8x1x8xf32> to vector<8x8xf32>
    %15 = vector.extract_strided_slice %2 {offsets = [0, 6, 0], sizes = [8, 1, 8], strides = [1, 1, 1]} : vector<8x8x8xf32> to vector<8x1x8xf32>
    %16 = vector.shape_cast %15 : vector<8x1x8xf32> to vector<8x8xf32>
    %17 = vector.extract_strided_slice %2 {offsets = [0, 7, 0], sizes = [8, 1, 8], strides = [1, 1, 1]} : vector<8x8x8xf32> to vector<8x1x8xf32>
    %18 = vector.shape_cast %17 : vector<8x1x8xf32> to vector<8x8xf32>
    %19 = tpu.concatenate %4, %6, %8, %10, %12, %14, %16, %18 in 1 : vector<8x8xf32>, vector<8x8xf32>, vector<8x8xf32>, vector<8x8xf32>, vector<8x8xf32>, vector<8x8xf32>, vector<8x8xf32>, vector<8x8xf32> -> vector<8x64xf32>
    %c0_5 = arith.constant 0 : index
    %c0_6 = arith.constant 0 : index
    %c0_7 = arith.constant 0 : index
    %20 = vector.load %arg3[%c0_5, %c0_6, %c0_7] : memref<4x8x64xf32, #tpu.memory_space<vmem>>, vector<1x8x64xf32>
    %21 = vector.shape_cast %20 : vector<1x8x64xf32> to vector<8x64xf32>
    %22 = vector.shape_cast %19 : vector<8x64xf32> to vector<1x8x64xf32>
    tpu.vector_store %arg3[%c0_5, %c0_6, %c0_7], %22 {strides = array<i32>} : memref<4x8x64xf32, #tpu.memory_space<vmem>>, vector<1x8x64xf32>,
    %23 = vector.extract_strided_slice %1 {offsets = [0, 0, 0], sizes = [8, 8, 8], strides = [1, 1, 1]} : vector<8x8x16xf32> to vector<8x8x8xf32>
    %24 = vector.extract_strided_slice %23 {offsets = [0, 0, 0], sizes = [8, 1, 8], strides = [1, 1, 1]} : vector<8x8x8xf32> to vector<8x1x8xf32>
    %25 = vector.shape_cast %24 : vector<8x1x8xf32> to vector<8x8xf32>
    %26 = vector.extract_strided_slice %23 {offsets = [0, 1, 0], sizes = [8, 1, 8], strides = [1, 1, 1]} : vector<8x8x8xf32> to vector<8x1x8xf32>
    %27 = vector.shape_cast %26 : vector<8x1x8xf32> to vector<8x8xf32>
    %28 = vector.extract_strided_slice %23 {offsets = [0, 2, 0], sizes = [8, 1, 8], strides = [1, 1, 1]} : vector<8x8x8xf32> to vector<8x1x8xf32>
    %29 = vector.shape_cast %28 : vector<8x1x8xf32> to vector<8x8xf32>
    %30 = vector.extract_strided_slice %23 {offsets = [0, 3, 0], sizes = [8, 1, 8], strides = [1, 1, 1]} : vector<8x8x8xf32> to vector<8x1x8xf32>
    %31 = vector.shape_cast %30 : vector<8x1x8xf32> to vector<8x8xf32>
    %32 = vector.extract_strided_slice %23 {offsets = [0, 4, 0], sizes = [8, 1, 8], strides = [1, 1, 1]} : vector<8x8x8xf32> to vector<8x1x8xf32>
    %33 = vector.shape_cast %32 : vector<8x1x8xf32> to vector<8x8xf32>
    %34 = vector.extract_strided_slice %23 {offsets = [0, 5, 0], sizes = [8, 1, 8], strides = [1, 1, 1]} : vector<8x8x8xf32> to vector<8x1x8xf32>
    %35 = vector.shape_cast %34 : vector<8x1x8xf32> to vector<8x8xf32>
    %36 = vector.extract_strided_slice %23 {offsets = [0, 6, 0], sizes = [8, 1, 8], strides = [1, 1, 1]} : vector<8x8x8xf32> to vector<8x1x8xf32>
    %37 = vector.shape_cast %36 : vector<8x1x8xf32> to vector<8x8xf32>
    %38 = vector.extract_strided_slice %23 {offsets = [0, 7, 0], sizes = [8, 1, 8], strides = [1, 1, 1]} : vector<8x8x8xf32> to vector<8x1x8xf32>
    %39 = vector.shape_cast %38 : vector<8x1x8xf32> to vector<8x8xf32>
    %40 = tpu.concatenate %25, %27, %29, %31, %33, %35, %37, %39 in 1 : vector<8x8xf32>, vector<8x8xf32>, vector<8x8xf32>, vector<8x8xf32>, vector<8x8xf32>, vector<8x8xf32>, vector<8x8xf32>, vector<8x8xf32> -> vector<8x64xf32>
    %c0_8 = arith.constant 0 : index
    %c0_9 = arith.constant 0 : index
    %c0_10 = arith.constant 0 : index
    %41 = vector.load %arg4[%c0_8, %c0_9, %c0_10] : memref<4x8x64xf32, #tpu.memory_space<vmem>>, vector<1x8x64xf32>
    %42 = vector.shape_cast %41 : vector<1x8x64xf32> to vector<8x64xf32>
    %43 = vector.shape_cast %40 : vector<8x64xf32> to vector<1x8x64xf32>
    tpu.vector_store %arg4[%c0_8, %c0_9, %c0_10], %43 {strides = array<i32>} : memref<4x8x64xf32, #tpu.memory_space<vmem>>, vector<1x8x64xf32>,
    %44 = vector.extract_strided_slice %0 {offsets = [0, 0, 8], sizes = [8, 8, 8], strides = [1, 1, 1]} : vector<8x8x16xf32> to vector<8x8x8xf32>
    %45 = vector.extract_strided_slice %44 {offsets = [0, 0, 0], sizes = [8, 1, 8], strides = [1, 1, 1]} : vector<8x8x8xf32> to vector<8x1x8xf32>
    %46 = vector.shape_cast %45 : vector<8x1x8xf32> to vector<8x8xf32>
    %47 = vector.extract_strided_slice %44 {offsets = [0, 1, 0], sizes = [8, 1, 8], strides = [1, 1, 1]} : vector<8x8x8xf32> to vector<8x1x8xf32>
    %48 = vector.shape_cast %47 : vector<8x1x8xf32> to vector<8x8xf32>
    %49 = vector.extract_strided_slice %44 {offsets = [0, 2, 0], sizes = [8, 1, 8], strides = [1, 1, 1]} : vector<8x8x8xf32> to vector<8x1x8xf32>
    %50 = vector.shape_cast %49 : vector<8x1x8xf32> to vector<8x8xf32>
    %51 = vector.extract_strided_slice %44 {offsets = [0, 3, 0], sizes = [8, 1, 8], strides = [1, 1, 1]} : vector<8x8x8xf32> to vector<8x1x8xf32>
    %52 = vector.shape_cast %51 : vector<8x1x8xf32> to vector<8x8xf32>
    %53 = vector.extract_strided_slice %44 {offsets = [0, 4, 0], sizes = [8, 1, 8], strides = [1, 1, 1]} : vector<8x8x8xf32> to vector<8x1x8xf32>
    %54 = vector.shape_cast %53 : vector<8x1x8xf32> to vector<8x8xf32>
    %55 = vector.extract_strided_slice %44 {offsets = [0, 5, 0], sizes = [8, 1, 8], strides = [1, 1, 1]} : vector<8x8x8xf32> to vector<8x1x8xf32>
    %56 = vector.shape_cast %55 : vector<8x1x8xf32> to vector<8x8xf32>
    %57 = vector.extract_strided_slice %44 {offsets = [0, 6, 0], sizes = [8, 1, 8], strides = [1, 1, 1]} : vector<8x8x8xf32> to vector<8x1x8xf32>
    %58 = vector.shape_cast %57 : vector<8x1x8xf32> to vector<8x8xf32>
    %59 = vector.extract_strided_slice %44 {offsets = [0, 7, 0], sizes = [8, 1, 8], strides = [1, 1, 1]} : vector<8x8x8xf32> to vector<8x1x8xf32>
    %60 = vector.shape_cast %59 : vector<8x1x8xf32> to vector<8x8xf32>
    %61 = tpu.concatenate %46, %48, %50, %52, %54, %56, %58, %60 in 1 : vector<8x8xf32>, vector<8x8xf32>, vector<8x8xf32>, vector<8x8xf32>, vector<8x8xf32>, vector<8x8xf32>, vector<8x8xf32>, vector<8x8xf32> -> vector<8x64xf32>
    %c1 = arith.constant 1 : index
    %c0_11 = arith.constant 0 : index
    %c0_12 = arith.constant 0 : index
    %62 = vector.load %arg3[%c1, %c0_11, %c0_12] : memref<4x8x64xf32, #tpu.memory_space<vmem>>, vector<1x8x64xf32>
    %63 = vector.shape_cast %62 : vector<1x8x64xf32> to vector<8x64xf32>
    %64 = vector.shape_cast %61 : vector<8x64xf32> to vector<1x8x64xf32>
    tpu.vector_store %arg3[%c1, %c0_11, %c0_12], %64 {strides = array<i32>} : memref<4x8x64xf32, #tpu.memory_space<vmem>>, vector<1x8x64xf32>,
    %65 = vector.extract_strided_slice %1 {offsets = [0, 0, 8], sizes = [8, 8, 8], strides = [1, 1, 1]} : vector<8x8x16xf32> to vector<8x8x8xf32>
    %66 = vector.extract_strided_slice %65 {offsets = [0, 0, 0], sizes = [8, 1, 8], strides = [1, 1, 1]} : vector<8x8x8xf32> to vector<8x1x8xf32>
    %67 = vector.shape_cast %66 : vector<8x1x8xf32> to vector<8x8xf32>
    %68 = vector.extract_strided_slice %65 {offsets = [0, 1, 0], sizes = [8, 1, 8], strides = [1, 1, 1]} : vector<8x8x8xf32> to vector<8x1x8xf32>
    %69 = vector.shape_cast %68 : vector<8x1x8xf32> to vector<8x8xf32>
    %70 = vector.extract_strided_slice %65 {offsets = [0, 2, 0], sizes = [8, 1, 8], strides = [1, 1, 1]} : vector<8x8x8xf32> to vector<8x1x8xf32>
    %71 = vector.shape_cast %70 : vector<8x1x8xf32> to vector<8x8xf32>
    %72 = vector.extract_strided_slice %65 {offsets = [0, 3, 0], sizes = [8, 1, 8], strides = [1, 1, 1]} : vector<8x8x8xf32> to vector<8x1x8xf32>
    %73 = vector.shape_cast %72 : vector<8x1x8xf32> to vector<8x8xf32>
    %74 = vector.extract_strided_slice %65 {offsets = [0, 4, 0], sizes = [8, 1, 8], strides = [1, 1, 1]} : vector<8x8x8xf32> to vector<8x1x8xf32>
    %75 = vector.shape_cast %74 : vector<8x1x8xf32> to vector<8x8xf32>
    %76 = vector.extract_strided_slice %65 {offsets = [0, 5, 0], sizes = [8, 1, 8], strides = [1, 1, 1]} : vector<8x8x8xf32> to vector<8x1x8xf32>
    %77 = vector.shape_cast %76 : vector<8x1x8xf32> to vector<8x8xf32>
    %78 = vector.extract_strided_slice %65 {offsets = [0, 6, 0], sizes = [8, 1, 8], strides = [1, 1, 1]} : vector<8x8x8xf32> to vector<8x1x8xf32>
    %79 = vector.shape_cast %78 : vector<8x1x8xf32> to vector<8x8xf32>
    %80 = vector.extract_strided_slice %65 {offsets = [0, 7, 0], sizes = [8, 1, 8], strides = [1, 1, 1]} : vector<8x8x8xf32> to vector<8x1x8xf32>
    %81 = vector.shape_cast %80 : vector<8x1x8xf32> to vector<8x8xf32>
    %82 = tpu.concatenate %67, %69, %71, %73, %75, %77, %79, %81 in 1 : vector<8x8xf32>, vector<8x8xf32>, vector<8x8xf32>, vector<8x8xf32>, vector<8x8xf32>, vector<8x8xf32>, vector<8x8xf32>, vector<8x8xf32> -> vector<8x64xf32>
    %c1_13 = arith.constant 1 : index
    %c0_14 = arith.constant 0 : index
    %c0_15 = arith.constant 0 : index
    %83 = vector.load %arg4[%c1_13, %c0_14, %c0_15] : memref<4x8x64xf32, #tpu.memory_space<vmem>>, vector<1x8x64xf32>
    %84 = vector.shape_cast %83 : vector<1x8x64xf32> to vector<8x64xf32>
    %85 = vector.shape_cast %82 : vector<8x64xf32> to vector<1x8x64xf32>
    tpu.vector_store %arg4[%c1_13, %c0_14, %c0_15], %85 {strides = array<i32>} : memref<4x8x64xf32, #tpu.memory_space<vmem>>, vector<1x8x64xf32>,
    %c0_16 = arith.constant 0 : index
    %c8 = arith.constant 8 : index
    %c0_17 = arith.constant 0 : index
    %86 = vector.load %arg1[%c0_16, %c8, %c0_17] : memref<8x16x16xf32, #tpu.memory_space<vmem>>, vector<8x8x16xf32>
    %c0_18 = arith.constant 0 : index
    %c8_19 = arith.constant 8 : index
    %c0_20 = arith.constant 0 : index
    %87 = vector.load %arg2[%c0_18, %c8_19, %c0_20] : memref<8x16x16xf32, #tpu.memory_space<vmem>>, vector<8x8x16xf32>
    %88 = vector.extract_strided_slice %86 {offsets = [0, 0, 0], sizes = [8, 8, 8], strides = [1, 1, 1]} : vector<8x8x16xf32> to vector<8x8x8xf32>
    %89 = vector.extract_strided_slice %88 {offsets = [0, 0, 0], sizes = [8, 1, 8], strides = [1, 1, 1]} : vector<8x8x8xf32> to vector<8x1x8xf32>
    %90 = vector.shape_cast %89 : vector<8x1x8xf32> to vector<8x8xf32>
    %91 = vector.extract_strided_slice %88 {offsets = [0, 1, 0], sizes = [8, 1, 8], strides = [1, 1, 1]} : vector<8x8x8xf32> to vector<8x1x8xf32>
    %92 = vector.shape_cast %91 : vector<8x1x8xf32> to vector<8x8xf32>
    %93 = vector.extract_strided_slice %88 {offsets = [0, 2, 0], sizes = [8, 1, 8], strides = [1, 1, 1]} : vector<8x8x8xf32> to vector<8x1x8xf32>
    %94 = vector.shape_cast %93 : vector<8x1x8xf32> to vector<8x8xf32>
    %95 = vector.extract_strided_slice %88 {offsets = [0, 3, 0], sizes = [8, 1, 8], strides = [1, 1, 1]} : vector<8x8x8xf32> to vector<8x1x8xf32>
    %96 = vector.shape_cast %95 : vector<8x1x8xf32> to vector<8x8xf32>
    %97 = vector.extract_strided_slice %88 {offsets = [0, 4, 0], sizes = [8, 1, 8], strides = [1, 1, 1]} : vector<8x8x8xf32> to vector<8x1x8xf32>
    %98 = vector.shape_cast %97 : vector<8x1x8xf32> to vector<8x8xf32>
    %99 = vector.extract_strided_slice %88 {offsets = [0, 5, 0], sizes = [8, 1, 8], strides = [1, 1, 1]} : vector<8x8x8xf32> to vector<8x1x8xf32>
    %100 = vector.shape_cast %99 : vector<8x1x8xf32> to vector<8x8xf32>
    %101 = vector.extract_strided_slice %88 {offsets = [0, 6, 0], sizes = [8, 1, 8], strides = [1, 1, 1]} : vector<8x8x8xf32> to vector<8x1x8xf32>
    %102 = vector.shape_cast %101 : vector<8x1x8xf32> to vector<8x8xf32>
    %103 = vector.extract_strided_slice %88 {offsets = [0, 7, 0], sizes = [8, 1, 8], strides = [1, 1, 1]} : vector<8x8x8xf32> to vector<8x1x8xf32>
    %104 = vector.shape_cast %103 : vector<8x1x8xf32> to vector<8x8xf32>
    %105 = tpu.concatenate %90, %92, %94, %96, %98, %100, %102, %104 in 1 : vector<8x8xf32>, vector<8x8xf32>, vector<8x8xf32>, vector<8x8xf32>, vector<8x8xf32>, vector<8x8xf32>, vector<8x8xf32>, vector<8x8xf32> -> vector<8x64xf32>
    %c2 = arith.constant 2 : index
    %c0_21 = arith.constant 0 : index
    %c0_22 = arith.constant 0 : index
    %106 = vector.load %arg3[%c2, %c0_21, %c0_22] : memref<4x8x64xf32, #tpu.memory_space<vmem>>, vector<1x8x64xf32>
    %107 = vector.shape_cast %106 : vector<1x8x64xf32> to vector<8x64xf32>
    %108 = vector.shape_cast %105 : vector<8x64xf32> to vector<1x8x64xf32>
    tpu.vector_store %arg3[%c2, %c0_21, %c0_22], %108 {strides = array<i32>} : memref<4x8x64xf32, #tpu.memory_space<vmem>>, vector<1x8x64xf32>,
    %109 = vector.extract_strided_slice %87 {offsets = [0, 0, 0], sizes = [8, 8, 8], strides = [1, 1, 1]} : vector<8x8x16xf32> to vector<8x8x8xf32>
    %110 = vector.extract_strided_slice %109 {offsets = [0, 0, 0], sizes = [8, 1, 8], strides = [1, 1, 1]} : vector<8x8x8xf32> to vector<8x1x8xf32>
    %111 = vector.shape_cast %110 : vector<8x1x8xf32> to vector<8x8xf32>
    %112 = vector.extract_strided_slice %109 {offsets = [0, 1, 0], sizes = [8, 1, 8], strides = [1, 1, 1]} : vector<8x8x8xf32> to vector<8x1x8xf32>
    %113 = vector.shape_cast %112 : vector<8x1x8xf32> to vector<8x8xf32>
    %114 = vector.extract_strided_slice %109 {offsets = [0, 2, 0], sizes = [8, 1, 8], strides = [1, 1, 1]} : vector<8x8x8xf32> to vector<8x1x8xf32>
    %115 = vector.shape_cast %114 : vector<8x1x8xf32> to vector<8x8xf32>
    %116 = vector.extract_strided_slice %109 {offsets = [0, 3, 0], sizes = [8, 1, 8], strides = [1, 1, 1]} : vector<8x8x8xf32> to vector<8x1x8xf32>
    %117 = vector.shape_cast %116 : vector<8x1x8xf32> to vector<8x8xf32>
    %118 = vector.extract_strided_slice %109 {offsets = [0, 4, 0], sizes = [8, 1, 8], strides = [1, 1, 1]} : vector<8x8x8xf32> to vector<8x1x8xf32>
    %119 = vector.shape_cast %118 : vector<8x1x8xf32> to vector<8x8xf32>
    %120 = vector.extract_strided_slice %109 {offsets = [0, 5, 0], sizes = [8, 1, 8], strides = [1, 1, 1]} : vector<8x8x8xf32> to vector<8x1x8xf32>
    %121 = vector.shape_cast %120 : vector<8x1x8xf32> to vector<8x8xf32>
    %122 = vector.extract_strided_slice %109 {offsets = [0, 6, 0], sizes = [8, 1, 8], strides = [1, 1, 1]} : vector<8x8x8xf32> to vector<8x1x8xf32>
    %123 = vector.shape_cast %122 : vector<8x1x8xf32> to vector<8x8xf32>
    %124 = vector.extract_strided_slice %109 {offsets = [0, 7, 0], sizes = [8, 1, 8], strides = [1, 1, 1]} : vector<8x8x8xf32> to vector<8x1x8xf32>
    %125 = vector.shape_cast %124 : vector<8x1x8xf32> to vector<8x8xf32>
    %126 = tpu.concatenate %111, %113, %115, %117, %119, %121, %123, %125 in 1 : vector<8x8xf32>, vector<8x8xf32>, vector<8x8xf32>, vector<8x8xf32>, vector<8x8xf32>, vector<8x8xf32>, vector<8x8xf32>, vector<8x8xf32> -> vector<8x64xf32>
    %c2_23 = arith.constant 2 : index
    %c0_24 = arith.constant 0 : index
    %c0_25 = arith.constant 0 : index
    %127 = vector.load %arg4[%c2_23, %c0_24, %c0_25] : memref<4x8x64xf32, #tpu.memory_space<vmem>>, vector<1x8x64xf32>
    %128 = vector.shape_cast %127 : vector<1x8x64xf32> to vector<8x64xf32>
    %129 = vector.shape_cast %126 : vector<8x64xf32> to vector<1x8x64xf32>
    tpu.vector_store %arg4[%c2_23, %c0_24, %c0_25], %129 {strides = array<i32>} : memref<4x8x64xf32, #tpu.memory_space<vmem>>, vector<1x8x64xf32>,
    %130 = vector.extract_strided_slice %86 {offsets = [0, 0, 8], sizes = [8, 8, 8], strides = [1, 1, 1]} : vector<8x8x16xf32> to vector<8x8x8xf32>
    %131 = vector.extract_strided_slice %130 {offsets = [0, 0, 0], sizes = [8, 1, 8], strides = [1, 1, 1]} : vector<8x8x8xf32> to vector<8x1x8xf32>
    %132 = vector.shape_cast %131 : vector<8x1x8xf32> to vector<8x8xf32>
    %133 = vector.extract_strided_slice %130 {offsets = [0, 1, 0], sizes = [8, 1, 8], strides = [1, 1, 1]} : vector<8x8x8xf32> to vector<8x1x8xf32>
    %134 = vector.shape_cast %133 : vector<8x1x8xf32> to vector<8x8xf32>
    %135 = vector.extract_strided_slice %130 {offsets = [0, 2, 0], sizes = [8, 1, 8], strides = [1, 1, 1]} : vector<8x8x8xf32> to vector<8x1x8xf32>
    %136 = vector.shape_cast %135 : vector<8x1x8xf32> to vector<8x8xf32>
    %137 = vector.extract_strided_slice %130 {offsets = [0, 3, 0], sizes = [8, 1, 8], strides = [1, 1, 1]} : vector<8x8x8xf32> to vector<8x1x8xf32>
    %138 = vector.shape_cast %137 : vector<8x1x8xf32> to vector<8x8xf32>
    %139 = vector.extract_strided_slice %130 {offsets = [0, 4, 0], sizes = [8, 1, 8], strides = [1, 1, 1]} : vector<8x8x8xf32> to vector<8x1x8xf32>
    %140 = vector.shape_cast %139 : vector<8x1x8xf32> to vector<8x8xf32>
    %141 = vector.extract_strided_slice %130 {offsets = [0, 5, 0], sizes = [8, 1, 8], strides = [1, 1, 1]} : vector<8x8x8xf32> to vector<8x1x8xf32>
    %142 = vector.shape_cast %141 : vector<8x1x8xf32> to vector<8x8xf32>
    %143 = vector.extract_strided_slice %130 {offsets = [0, 6, 0], sizes = [8, 1, 8], strides = [1, 1, 1]} : vector<8x8x8xf32> to vector<8x1x8xf32>
    %144 = vector.shape_cast %143 : vector<8x1x8xf32> to vector<8x8xf32>
    %145 = vector.extract_strided_slice %130 {offsets = [0, 7, 0], sizes = [8, 1, 8], strides = [1, 1, 1]} : vector<8x8x8xf32> to vector<8x1x8xf32>
    %146 = vector.shape_cast %145 : vector<8x1x8xf32> to vector<8x8xf32>
    %147 = tpu.concatenate %132, %134, %136, %138, %140, %142, %144, %146 in 1 : vector<8x8xf32>, vector<8x8xf32>, vector<8x8xf32>, vector<8x8xf32>, vector<8x8xf32>, vector<8x8xf32>, vector<8x8xf32>, vector<8x8xf32> -> vector<8x64xf32>
    %c3 = arith.constant 3 : index
    %c0_26 = arith.constant 0 : index
    %c0_27 = arith.constant 0 : index
    %148 = vector.load %arg3[%c3, %c0_26, %c0_27] : memref<4x8x64xf32, #tpu.memory_space<vmem>>, vector<1x8x64xf32>
    %149 = vector.shape_cast %148 : vector<1x8x64xf32> to vector<8x64xf32>
    %150 = vector.shape_cast %147 : vector<8x64xf32> to vector<1x8x64xf32>
    tpu.vector_store %arg3[%c3, %c0_26, %c0_27], %150 {strides = array<i32>} : memref<4x8x64xf32, #tpu.memory_space<vmem>>, vector<1x8x64xf32>,
    %151 = vector.extract_strided_slice %87 {offsets = [0, 0, 8], sizes = [8, 8, 8], strides = [1, 1, 1]} : vector<8x8x16xf32> to vector<8x8x8xf32>
    %152 = vector.extract_strided_slice %151 {offsets = [0, 0, 0], sizes = [8, 1, 8], strides = [1, 1, 1]} : vector<8x8x8xf32> to vector<8x1x8xf32>
    %153 = vector.shape_cast %152 : vector<8x1x8xf32> to vector<8x8xf32>
    %154 = vector.extract_strided_slice %151 {offsets = [0, 1, 0], sizes = [8, 1, 8], strides = [1, 1, 1]} : vector<8x8x8xf32> to vector<8x1x8xf32>
    %155 = vector.shape_cast %154 : vector<8x1x8xf32> to vector<8x8xf32>
    %156 = vector.extract_strided_slice %151 {offsets = [0, 2, 0], sizes = [8, 1, 8], strides = [1, 1, 1]} : vector<8x8x8xf32> to vector<8x1x8xf32>
    %157 = vector.shape_cast %156 : vector<8x1x8xf32> to vector<8x8xf32>
    %158 = vector.extract_strided_slice %151 {offsets = [0, 3, 0], sizes = [8, 1, 8], strides = [1, 1, 1]} : vector<8x8x8xf32> to vector<8x1x8xf32>
    %159 = vector.shape_cast %158 : vector<8x1x8xf32> to vector<8x8xf32>
    %160 = vector.extract_strided_slice %151 {offsets = [0, 4, 0], sizes = [8, 1, 8], strides = [1, 1, 1]} : vector<8x8x8xf32> to vector<8x1x8xf32>
    %161 = vector.shape_cast %160 : vector<8x1x8xf32> to vector<8x8xf32>
    %162 = vector.extract_strided_slice %151 {offsets = [0, 5, 0], sizes = [8, 1, 8], strides = [1, 1, 1]} : vector<8x8x8xf32> to vector<8x1x8xf32>
    %163 = vector.shape_cast %162 : vector<8x1x8xf32> to vector<8x8xf32>
    %164 = vector.extract_strided_slice %151 {offsets = [0, 6, 0], sizes = [8, 1, 8], strides = [1, 1, 1]} : vector<8x8x8xf32> to vector<8x1x8xf32>
    %165 = vector.shape_cast %164 : vector<8x1x8xf32> to vector<8x8xf32>
    %166 = vector.extract_strided_slice %151 {offsets = [0, 7, 0], sizes = [8, 1, 8], strides = [1, 1, 1]} : vector<8x8x8xf32> to vector<8x1x8xf32>
    %167 = vector.shape_cast %166 : vector<8x1x8xf32> to vector<8x8xf32>
    %168 = tpu.concatenate %153, %155, %157, %159, %161, %163, %165, %167 in 1 : vector<8x8xf32>, vector<8x8xf32>, vector<8x8xf32>, vector<8x8xf32>, vector<8x8xf32>, vector<8x8xf32>, vector<8x8xf32>, vector<8x8xf32> -> vector<8x64xf32>
    %c3_28 = arith.constant 3 : index
    %c0_29 = arith.constant 0 : index
    %c0_30 = arith.constant 0 : index
    %169 = vector.load %arg4[%c3_28, %c0_29, %c0_30] : memref<4x8x64xf32, #tpu.memory_space<vmem>>, vector<1x8x64xf32>
    %170 = vector.shape_cast %169 : vector<1x8x64xf32> to vector<8x64xf32>
    %171 = vector.shape_cast %168 : vector<8x64xf32> to vector<1x8x64xf32>
    tpu.vector_store %arg4[%c3_28, %c0_29, %c0_30], %171 {strides = array<i32>} : memref<4x8x64xf32, #tpu.memory_space<vmem>>, vector<1x8x64xf32>,
    return
  }
  func.func @transform_0(%arg0: i32) -> (i32, i32, i32) {
    %c0_i32 = arith.constant 0 : i32
    %c0_i32_0 = arith.constant 0 : i32
    %c0_i32_1 = arith.constant 0 : i32
    return %arg0, %c0_i32, %c0_i32_0 : i32, i32, i32
  }
  func.func @transform_1(%arg0: i32) -> (i32, i32, i32) {
    %c0_i32 = arith.constant 0 : i32
    %c0_i32_0 = arith.constant 0 : i32
    %c0_i32_1 = arith.constant 0 : i32
    return %arg0, %c0_i32, %c0_i32_0 : i32, i32, i32
  }
  func.func @transform_2(%arg0: i32) -> (i32, i32, i32) {
    %c0_i32 = arith.constant 0 : i32
    %c0_i32_0 = arith.constant 0 : i32
    %c0_i32_1 = arith.constant 0 : i32
    return %c0_i32, %arg0, %c0_i32_0 : i32, i32, i32
  }
  func.func @transform_3(%arg0: i32) -> (i32, i32, i32) {
    %c0_i32 = arith.constant 0 : i32
    %c0_i32_0 = arith.constant 0 : i32
    %c0_i32_1 = arith.constant 0 : i32
    return %c0_i32, %arg0, %c0_i32_0 : i32, i32, i32
  }
}

</mosaic_0001>

<bundles_post_ra>
// kernel: tpu_custom_call.1
= control target key start
LH: loop header
LB: loop body
LE: loop exit
PB: predicated region body
PF: predicated region fallthrough
CT: control target
= control target key end

     0   :  { %9 = vsyncpa [#allocation3], 0  ;;  %s1814_s0 = inlined_call_operand.hbm [shape: f32[8,16,16], index: 0, kind: input, shape index: {}]   ;;  %s1815_s1 = inlined_call_operand.hbm [shape: f32[8,16,16], index: 1, kind: input, shape index: {}]   ;;  %s1816_s2 = inlined_call_operand.hbm [shape: f32[4,8,64], index: 2, kind: output, shape index: {0}]   ;;  %s1817_s3 = inlined_call_operand.hbm [shape: f32[4,8,64], index: 3, kind: output, shape index: {1}]  }
   0x1   :  { %10 = vsyncpa [#allocation6], 0 }
   0x2   :  { %11 = vsyncpa [#allocation4], 0 }
   0x3   :  { %12 = vsyncpa [#allocation9], 0  ;;  %s17_s14 = sshll.u32 %s1814_s0, 4  ;;  %s975_s15 = smov [#allocation2]   ;;  %s18_s14 = int_to_ptr.hbm [resolvable:$true] %s17_s14 }
   0x4   :  { %s19_s16 = sshll.u32 %s975_s15, 4  ;;  %s30_s19 = sshll.u32 %s1815_s1, 4  ;;  %s20_s16 = int_to_ptr.vmem [resolvable:$true] %s19_s16  ;;  %s31_s19 = int_to_ptr.hbm [resolvable:$true] %s30_s19 }
   0x5   :  { %s976_s20 = smov 128   ;;  %s977_s21 = smov 8  }
   0x6   :  { %25 = dma.hbm_to_vmem [thread:$0]  %s18_s14, 2048, %s20_s16, [#allocation3], %s976_s20, %s976_s20, %s977_s21  }
   0x7   :  { %s978_s22 = smov [#allocation5]  }
   0x8   :  { %s32_s23 = sshll.u32 %s978_s22, 4  ;;  %s33_s23 = int_to_ptr.vmem [resolvable:$true] %s32_s23 }
   0x9   :  { %38 = dma.hbm_to_vmem [thread:$0]  %s31_s19, 2048, %s33_s23, [#allocation6], %s976_s20, %s976_s20, %s977_s21  }
   0xa   :  { %967 = dma.done.wait [#allocation3], 2048  }
   0xb   :  { %968 = vsyncadd [#allocation3], 4294965248 }
   0xc   :  { %969 = dma.done.wait [#allocation6], 2048  }
   0xd   :  { %970 = vsyncadd [#allocation6], 4294965248  ;;  %vm72_vm0 = vcmask 1041409   ;;  %vm75_vm1 = vcmask 1042434   ;;  %vm78_vm2 = vcmask 1043459   ;;  %vm81_vm3 = vcmask 1044484  }
   0xe   :  { %v1020_v0 = vld [vmem:[#allocation2] sm:$0xff]  ;;  %v1022_v1 = vld [vmem:[#allocation2 + $0x10] sm:$0xff]  ;;  %vm84_vm4 = vcmask 1045509   ;;  %vm87_vm5 = vcmask 1046534   ;;  %vm90_vm6 = vcmask 1047559   ;;  %s979_s0 = smov 40  }
   0xf   :  { %v1024_v2 = vld [vmem:[#allocation2 + $0x20] sm:$0xff]  ;;  %v1026_v3 = vld [vmem:[#allocation2 + $0x30] sm:$0xff]  ;;  %v161_v6 = vrot.slane %v1020_v0, 5  ;;  %v162_v7 = vrot.slane %v1022_v1, 4  ;;  %v127_v13 = vrot.slane %v1020_v0, 3  ;;  %v128_v14 = vrot.slane %v1022_v1, 2 }
  0x10   :  { %v1028_v4 = vld [vmem:[#allocation2 + $0x40] sm:$0xff]  ;;  %v1030_v5 = vld [vmem:[#allocation2 + $0x50] sm:$0xff]  ;;  %v164_v8 = vrot.slane %v1024_v2, 3  ;;  %v166_v11 = vrot.slane %v1026_v3, 2  ;;  %v130_v18 = vrot.slane %v1024_v2, 1  ;;  %v93_v29 = vrot.slane %v1020_v0, 1 }
  0x11   :  { %v1035_v9 = vld [vmem:[#allocation2 + $0x60] sm:$0xff]  ;;  %v1037_v10 = vld [vmem:[#allocation2 + $0x70] sm:$0xff]  ;;  %v168_v12 = vrot.slane %v1028_v4, 1  ;;  %v163_v15 = vsel %vm72_vm0, %v162_v7, %v161_v6  ;;  %v129_v20 = vsel %vm72_vm0, %v128_v14, %v127_v13  ;;  %v133_v21 = vrot.slane %v1028_v4, 7  ;;  %s980_s1 = smov 24   ;;  %s981_s24 = smov 48  }
  0x12   :  { %v171_v16 = vrot.slane %v1035_v9, 7  ;;  %v173_v17 = vrot.slane %v1037_v10, 6  ;;  %v165_v19 = vsel %vm75_vm1, %v164_v8, %v163_v15  ;;  %v135_v22 = vrot.slane %v1030_v5, 6  ;;  %s982_s25 = smov 32   ;;  %s983_s26 = smov 16  }
  0x13   :  { %v167_v23 = vsel %vm78_vm2, %v166_v11, %v165_v19  ;;  %v131_v24 = vsel %vm75_vm1, %v130_v18, %v129_v20  ;;  %v137_v25 = vrot.slane %v1035_v9, 5  ;;  %v139_v26 = vrot.slane %v1037_v10, 4  ;;  %v1118_v19 = vld [vmem:[#allocation5] sm:$0xff]  ;;  %s984_s27 = smov 56   ;;  %s985_s28 = smov 120  }
  0x14   :  { %v169_v27 = vsel %vm81_vm3, %v168_v12, %v167_v23  ;;  %v132_v28 = vsel %vm78_vm2, %v1026_v3, %v131_v24  ;;  %v95_v30 = vrot.slane %v1024_v2, 7  ;;  %v97_v33 = vrot.slane %v1026_v3, 6  ;;  %v1126_v24 = vld [vmem:[#allocation5 + $0x10] sm:$0xff]  ;;  %s986_s29 = smov [#allocation8]   ;;  %s839_s6 = sshll.u32 %s1817_s3, 4  ;;  %s840_s6 = int_to_ptr.hbm [resolvable:$true] %s839_s6 }
  0x15   :  { %v170_v31 = vsel %vm84_vm4, %v1030_v5, %v169_v27  ;;  %v134_v32 = vsel %vm81_vm3, %v133_v21, %v132_v28  ;;  %v99_v34 = vrot.slane %v1028_v4, 5  ;;  %v94_v37 = vsel %vm72_vm0, %v1022_v1, %v93_v29  ;;  %s837_s30 = sshll.u32 %s986_s29, 4  ;;  %s987_s7 = smov [#allocation7]   ;;  %s838_s30 = int_to_ptr.vmem [resolvable:$true] %s837_s30 }
  0x16   :  { %v172_v35 = vsel %vm87_vm5, %v171_v16, %v170_v31  ;;  %v136_v36 = vsel %vm84_vm4, %v135_v22, %v134_v32  ;;  %v101_v38 = vrot.slane %v1030_v5, 4  ;;  %v96_v41 = vsel %vm75_vm1, %v95_v30, %v94_v37  ;;  %v1136_v30 = vld [vmem:[#allocation5 + $0x40] sm:$0xff]  ;;  %v1138_v31 = vld [vmem:[#allocation5 + $0x50] sm:$0xff]  ;;  %s824_s8 = sshll.u32 %s987_s7, 4  ;;  %s826_s11 = sshll.u32 %s1816_s2, 4  ;;  %s825_s8 = int_to_ptr.vmem [resolvable:$true] %s824_s8  ;;  %s827_s11 = int_to_ptr.hbm [resolvable:$true] %s826_s11 }
  0x17   :  { %v1071_v39 = vsel %vm90_vm6, %v173_v17, %v172_v35  ;;  %v138_v40 = vsel %vm87_vm5, %v137_v25, %v136_v36  ;;  %v103_v42 = vrot.slane %v1035_v9, 3  ;;  %v98_v44 = vsel %vm78_vm2, %v97_v33, %v96_v41  ;;  %v1128_v25 = vld [vmem:[#allocation5 + $0x30] sm:$0xff]  ;;  %v1140_v32 = vld [vmem:[#allocation5 + $0x60] sm:$0xff] }
  0x18   :  { %175 = vrot.lane.b32.xlu2 %v1071_v39, %s979_s0  ;;  %v1079_v43 = vsel %vm90_vm6, %v139_v26, %v138_v40  ;;  %v105_v45 = vrot.slane %v1037_v10, 2  ;;  %v178_v46 = vrot.slane %v1020_v0, 6  ;;  %v100_v47 = vsel %vm81_vm3, %v99_v34, %v98_v44  ;;  %v1148_v36 = vld [vmem:[#allocation5 + $0x70] sm:$0xff]  ;;  %v1155_v41 = vld [vmem:[#allocation5 + $0x20] sm:$0xff] }
  0x19   :  { %141 = vrot.lane.b32.xlu1 %v1079_v43, %s980_s1  ;;  %v179_v48 = vrot.slane %v1022_v1, 5  ;;  %v181_v49 = vrot.slane %v1024_v2, 4  ;;  %v183_v50 = vrot.slane %v1026_v3, 3  ;;  %v102_v51 = vsel %vm84_vm4, %v101_v38, %v100_v47 }
  0x1a   :  { %v185_v52 = vrot.slane %v1028_v4, 2  ;;  %v187_v53 = vrot.slane %v1030_v5, 1  ;;  %v190_v54 = vrot.slane %v1037_v10, 7  ;;  %v104_v55 = vsel %vm87_vm5, %v103_v42, %v102_v51 }
  0x1b   :  { %v180_v56 = vsel %vm72_vm0, %v179_v48, %v178_v46  ;;  %v144_v57 = vrot.slane %v1020_v0, 4  ;;  %v145_v58 = vrot.slane %v1022_v1, 3  ;;  %v1099_v59 = vsel %vm90_vm6, %v105_v45, %v104_v55 }
  0x1c   :  { %v182_v60 = vsel %vm75_vm1, %v181_v49, %v180_v56  ;;  %v147_v61 = vrot.slane %v1024_v2, 2  ;;  %v149_v62 = vrot.slane %v1026_v3, 1  ;;  %107 = vrot.lane.b32.xlu0 %v1099_v59, %s977_s21  ;;  %v152_v7 = vrot.slane %v1030_v5, 7 }
  0x1d   :  { %v184_v63 = vsel %vm78_vm2, %v183_v50, %v182_v60  ;;  %v146_v6 = vsel %vm72_vm0, %v145_v58, %v144_v57  ;;  %v154_v8 = vrot.slane %v1035_v9, 6  ;;  %v156_v13 = vrot.slane %v1037_v10, 5 }
  0x1e   :  { %v186_v11 = vsel %vm81_vm3, %v185_v52, %v184_v63  ;;  %v148_v12 = vsel %vm75_vm1, %v147_v61, %v146_v6  ;;  %v110_v14 = vrot.slane %v1020_v0, 2  ;;  %v111_v17 = vrot.slane %v1022_v1, 1 }
  0x1f   :  { %v188_v15 = vsel %vm84_vm4, %v187_v53, %v186_v11  ;;  %v150_v16 = vsel %vm78_vm2, %v149_v62, %v148_v12  ;;  %v114_v18 = vrot.slane %v1026_v3, 7  ;;  %v116_v22 = vrot.slane %v1028_v4, 6 }
  0x20   :  { %v189_v20 = vsel %vm87_vm5, %v1035_v9, %v188_v15  ;;  %v151_v21 = vsel %vm81_vm3, %v1028_v4, %v150_v16  ;;  %v118_v23 = vrot.slane %v1030_v5, 5  ;;  %v112_v28 = vsel %vm72_vm0, %v111_v17, %v110_v14 }
  0x21   :  { %v1131_v26 = vsel %vm90_vm6, %v190_v54, %v189_v20  ;;  %v153_v27 = vsel %vm84_vm4, %v152_v7, %v151_v21  ;;  %v120_v29 = vrot.slane %v1035_v9, 4  ;;  %v113_v34 = vsel %vm75_vm1, %v1024_v2, %v112_v28 }
  0x22   :  { %192 = vrot.lane.b32.xlu2 %v1131_v26, %s981_s24  ;;  %v155_v33 = vsel %vm87_vm5, %v154_v8, %v153_v27  ;;  %v122_v35 = vrot.slane %v1037_v10, 3  ;;  %v268_v37 = vrot.slane %v1118_v19, 2  ;;  %v115_v40 = vsel %vm78_vm2, %v114_v18, %v113_v34 }
  0x23   :  { %v1152_v38 = vsel %vm90_vm6, %v156_v13, %v155_v33  ;;  %v269_v42 = vrot.slane %v1126_v24, 1  ;;  %v272_v44 = vrot.slane %v1128_v25, 7  ;;  %v117_v45 = vsel %vm81_vm3, %v116_v22, %v115_v40 }
  0x24   :  { %158 = vrot.lane.b32.xlu1 %v1152_v38, %s982_s25  ;;  %v274_v46 = vrot.slane %v1136_v30, 6  ;;  %v276_v47 = vrot.slane %v1138_v31, 5  ;;  %v278_v48 = vrot.slane %v1140_v32, 4  ;;  %v119_v49 = vsel %vm84_vm4, %v118_v23, %v117_v45 }
  0x25   :  { %v270_v50 = vsel %vm72_vm0, %v269_v42, %v268_v37  ;;  %v280_v51 = vrot.slane %v1148_v36, 3  ;;  %v251_v52 = vrot.slane %v1118_v19, 1  ;;  %v121_v53 = vsel %vm87_vm5, %v120_v29, %v119_v49 }
  0x26   :  { %v271_v54 = vsel %vm75_vm1, %v1155_v41, %v270_v50  ;;  %v253_v55 = vrot.slane %v1155_v41, 7  ;;  %v255_v56 = vrot.slane %v1128_v25, 6  ;;  %v1175_v57 = vsel %vm90_vm6, %v122_v35, %v121_v53 }
  0x27   :  { %v273_v58 = vsel %vm78_vm2, %v272_v44, %v271_v54  ;;  %v252_v60 = vsel %vm72_vm0, %v1126_v24, %v251_v52  ;;  %v257_v61 = vrot.slane %v1136_v30, 5  ;;  %124 = vrot.lane.b32.xlu0 %v1175_v57, %s983_s26  ;;  %v259_v6 = vrot.slane %v1138_v31, 4 }
  0x28   :  { %v275_v62 = vsel %vm81_vm3, %v274_v46, %v273_v58  ;;  %v254_v63 = vsel %vm75_vm1, %v253_v55, %v252_v60  ;;  %v261_v7 = vrot.slane %v1140_v32, 3  ;;  %v263_v12 = vrot.slane %v1148_v36, 2 }
  0x29   :  { %v277_v8 = vsel %vm84_vm4, %v276_v47, %v275_v62  ;;  %v256_v11 = vsel %vm78_vm2, %v255_v56, %v254_v63  ;;  %v195_v13 = vrot.slane %v1020_v0, 7  ;;  %v196_v16 = vrot.slane %v1022_v1, 6 }
  0x2a   :  { %v279_v14 = vsel %vm87_vm5, %v278_v48, %v277_v8  ;;  %v258_v15 = vsel %vm81_vm3, %v257_v61, %v256_v11  ;;  %v198_v17 = vrot.slane %v1024_v2, 5  ;;  %v200_v21 = vrot.slane %v1026_v3, 4 }
  0x2b   :  { %v1196_v18 = vsel %vm90_vm6, %v280_v51, %v279_v14  ;;  %v260_v20 = vsel %vm84_vm4, %v259_v6, %v258_v15  ;;  %v202_v22 = vrot.slane %v1028_v4, 3  ;;  %v197_v27 = vsel %vm72_vm0, %v196_v16, %v195_v13 }
  0x2c   :  { %282 = vrot.lane.b32.xlu2 %v1196_v18, %s983_s26  ;;  %v262_v23 = vsel %vm87_vm5, %v261_v7, %v260_v20  ;;  %v204_v28 = vrot.slane %v1030_v5, 2  ;;  %v206_v29 = vrot.slane %v1035_v9, 1  ;;  %v199_v34 = vsel %vm75_vm1, %v198_v17, %v197_v27 }
  0x2d   :  { %v1208_v33 = vsel %vm90_vm6, %v263_v12, %v262_v23  ;;  %v319_v35 = vrot.slane %v1118_v19, 5  ;;  %v320_v37 = vrot.slane %v1126_v24, 4  ;;  %v201_v40 = vsel %vm78_vm2, %v200_v21, %v199_v34 }
  0x2e   :  { %265 = vrot.lane.b32.xlu1 %v1208_v33, %s977_s21  ;;  %v322_v42 = vrot.slane %v1155_v41, 3  ;;  %v324_v44 = vrot.slane %v1128_v25, 2  ;;  %v326_v45 = vrot.slane %v1136_v30, 1  ;;  %v203_v46 = vsel %vm81_vm3, %v202_v22, %v201_v40 }
  0x2f   :  { %v321_v47 = vsel %vm72_vm0, %v320_v37, %v319_v35  ;;  %v329_v48 = vrot.slane %v1140_v32, 7  ;;  %v331_v49 = vrot.slane %v1148_v36, 6  ;;  %v205_v50 = vsel %vm84_vm4, %v204_v28, %v203_v46 }
  0x30   :  { %v323_v51 = vsel %vm75_vm1, %v322_v42, %v321_v47  ;;  %v302_v52 = vrot.slane %v1118_v19, 4  ;;  %v303_v53 = vrot.slane %v1126_v24, 3  ;;  %v207_v54 = vsel %vm87_vm5, %v206_v29, %v205_v50 }
  0x31   :  { %v325_v55 = vsel %vm78_vm2, %v324_v44, %v323_v51  ;;  %v305_v56 = vrot.slane %v1155_v41, 2  ;;  %v307_v58 = vrot.slane %v1128_v25, 1  ;;  %v1233_v60 = vsel %vm90_vm6, %v1037_v10, %v207_v54 }
  0x32   :  { %v327_v61 = vsel %vm81_vm3, %v326_v45, %v325_v55  ;;  %v304_v62 = vsel %vm72_vm0, %v303_v53, %v302_v52  ;;  %v310_v63 = vrot.slane %v1138_v31, 7  ;;  %209 = vrot.lane.b32.xlu0 %v1233_v60, %s984_s27  ;;  %v312_v8 = vrot.slane %v1140_v32, 6 }
  0x33   :  { %v328_v6 = vsel %vm84_vm4, %v1138_v31, %v327_v61  ;;  %v306_v7 = vsel %vm75_vm1, %v305_v56, %v304_v62  ;;  %v314_v11 = vrot.slane %v1148_v36, 5  ;;  %v285_v14 = vrot.slane %v1118_v19, 3 }
  0x34   :  { %v330_v12 = vsel %vm87_vm5, %v329_v48, %v328_v6  ;;  %v308_v13 = vsel %vm78_vm2, %v307_v58, %v306_v7  ;;  %v286_v15 = vrot.slane %v1126_v24, 2  ;;  %v288_v20 = vrot.slane %v1155_v41, 1 }
  0x35   :  { %v1250_v16 = vsel %vm90_vm6, %v331_v49, %v330_v12  ;;  %v309_v17 = vsel %vm81_vm3, %v1136_v30, %v308_v13  ;;  %v291_v21 = vrot.slane %v1136_v30, 7  ;;  %v293_v27 = vrot.slane %v1138_v31, 6 }
  0x36   :  { %333 = vrot.lane.b32.xlu2 %v1250_v16, %s979_s0  ;;  %v311_v22 = vsel %vm84_vm4, %v310_v63, %v309_v17  ;;  %v287_v23 = vsel %vm72_vm0, %v286_v15, %v285_v14  ;;  %v295_v28 = vrot.slane %v1140_v32, 5  ;;  %v297_v35 = vrot.slane %v1148_v36, 4 }
  0x37   :  { %v313_v29 = vsel %vm87_vm5, %v312_v8, %v311_v22  ;;  %v289_v34 = vsel %vm75_vm1, %v288_v20, %v287_v23  ;;  %v353_v37 = vrot.slane %v1118_v19, 7  ;;  %v354_v44 = vrot.slane %v1126_v24, 6 }
  0x38   :  { %v1267_v40 = vsel %vm90_vm6, %v314_v11, %v313_v29  ;;  %v290_v42 = vsel %vm78_vm2, %v1128_v25, %v289_v34  ;;  %v356_v45 = vrot.slane %v1155_v41, 5  ;;  %v358_v47 = vrot.slane %v1128_v25, 4 }
  0x39   :  { %316 = vrot.lane.b32.xlu1 %v1267_v40, %s982_s25  ;;  %v292_v46 = vsel %vm81_vm3, %v291_v21, %v290_v42  ;;  %v360_v48 = vrot.slane %v1136_v30, 3  ;;  %v362_v49 = vrot.slane %v1138_v31, 2  ;;  %v355_v51 = vsel %vm72_vm0, %v354_v44, %v353_v37 }
  0x3a   :  { %v294_v50 = vsel %vm84_vm4, %v293_v27, %v292_v46  ;;  %v364_v52 = vrot.slane %v1140_v32, 1  ;;  %v336_v53 = vrot.slane %v1118_v19, 6  ;;  %v357_v55 = vsel %vm75_vm1, %v356_v45, %v355_v51  ;;  %v1352_v51 = vld [vmem:[#allocation2 + $0x18] sm:$0xff] }
  0x3b   :  { %v296_v54 = vsel %vm87_vm5, %v295_v28, %v294_v50  ;;  %v337_v56 = vrot.slane %v1126_v24, 5  ;;  %v339_v58 = vrot.slane %v1155_v41, 4  ;;  %v359_v62 = vsel %vm78_vm2, %v358_v47, %v357_v55 }
  0x3c   :  { %v1288_v61 = vsel %vm90_vm6, %v297_v35, %v296_v54  ;;  %v341_v63 = vrot.slane %v1128_v25, 3  ;;  %v343_v6 = vrot.slane %v1136_v30, 2  ;;  %v361_v7 = vsel %vm81_vm3, %v360_v48, %v359_v62  ;;  %v1365_v54 = vld [vmem:[#allocation2 + $0x48] sm:$0xff] }
  0x3d   :  { %299 = vrot.lane.b32.xlu0 %v1288_v61, %s980_s1  ;;  %v338_v8 = vsel %vm72_vm0, %v337_v56, %v336_v53  ;;  %v345_v11 = vrot.slane %v1138_v31, 1  ;;  %v348_v12 = vrot.slane %v1148_v36, 7  ;;  %v363_v13 = vsel %vm84_vm4, %v362_v49, %v361_v7 }
  0x3e   :  { %v340_v14 = vsel %vm75_vm1, %v339_v58, %v338_v8  ;;  %v71_v15 = vrot.slane %v1022_v1, 7  ;;  %v74_v17 = vrot.slane %v1024_v2, 6  ;;  %v365_v20 = vsel %vm87_vm5, %v364_v52, %v363_v13  ;;  %v1354_v52 = vld [vmem:[#allocation2 + $0x38] sm:$0xff] }
  0x3f   :  { %v342_v21 = vsel %vm78_vm2, %v341_v63, %v340_v14  ;;  %v77_v22 = vrot.slane %v1026_v3, 5  ;;  %v80_v23 = vrot.slane %v1028_v4, 4  ;;  %v1309_v27 = vsel %vm90_vm6, %v1148_v36, %v365_v20 }
  0x40   :  { %v344_v28 = vsel %vm81_vm3, %v343_v6, %v342_v21  ;;  %v73_v29 = vsel %vm72_vm0, %v71_v15, %v1020_v0  ;;  %v83_v1 = vrot.slane %v1030_v5, 3  ;;  %v86_v4 = vrot.slane %v1035_v9, 2 }
  0x41   :  { %367 = vrot.lane.b32.xlu1 %v1309_v27, %s984_s27  ;;  %v346_v2 = vsel %vm84_vm4, %v345_v11, %v344_v28  ;;  %v76_v3 = vsel %vm75_vm1, %v74_v17, %v73_v29  ;;  %v89_v37 = vrot.slane %v1037_v10, 1  ;;  %v236_v0 = vrot.slane %v1126_v24, 7  ;;  %v1339_v24 = vld [vmem:[#allocation2 + $0x8] sm:$0xff] }
  0x42   :  { %v347_v34 = vsel %vm87_vm5, %v1140_v32, %v346_v2  ;;  %v79_v35 = vsel %vm78_vm2, %v77_v22, %v76_v3  ;;  %v238_v45 = vrot.slane %v1155_v41, 6  ;;  %v240_v47 = vrot.slane %v1128_v25, 5  ;;  %v1347_v41 = vld [vmem:[#allocation2 + $0x28] sm:$0xff] }
  0x43   :  { %v1326_v5 = vsel %vm90_vm6, %v348_v12, %v347_v34  ;;  %v82_v42 = vsel %vm81_vm3, %v80_v23, %v79_v35  ;;  %v237_v10 = vsel %vm72_vm0, %v236_v0, %v1118_v19  ;;  %v479_v49 = vrot.slane %v1339_v24, 1  ;;  %v1386_v12 = vld [vmem:[#allocation2 + $0x68] sm:$0xff] }
  0x44   :  { %v85_v44 = vsel %vm84_vm4, %v83_v1, %v82_v42  ;;  %v239_v48 = vsel %vm75_vm1, %v238_v45, %v237_v10  ;;  %v242_v50 = vrot.slane %v1136_v30, 4  ;;  %v481_v53 = vrot.slane %v1347_v41, 7 }
  0x45   :  { %350 = vrot.lane.b32.xlu0 %v1326_v5, %s981_s24  ;;  %v88_v9 = vsel %vm87_vm5, %v86_v4, %v85_v44  ;;  %v241_v19 = vsel %vm78_vm2, %v240_v47, %v239_v48  ;;  %v244_v25 = vrot.slane %v1138_v31, 3  ;;  %v483_v55 = vrot.slane %v1354_v52, 6 }
  0x46   :  { %v1335_v46 = vsel %vm90_vm6, %v89_v37, %v88_v9  ;;  %v243_v30 = vsel %vm81_vm3, %v242_v50, %v241_v19  ;;  %v496_v56 = vrot.slane %v1339_v24, 2  ;;  %v497_v58 = vrot.slane %v1352_v51, 1 }
  0x47   :  { %378 = vrot.lane.b32.xlu2 %v1335_v46, %s985_s28  ;;  %v246_v31 = vrot.slane %v1140_v32, 2  ;;  %v245_v62 = vsel %vm84_vm4, %v244_v25, %v243_v30  ;;  %v485_v63 = vrot.slane %v1365_v54, 5  ;;  %v248_v11 = vrot.slane %v1148_v36, 1 }
  0x48   :  { %v498_v7 = vsel %vm72_vm0, %v497_v58, %v496_v56  ;;  %v500_v32 = vrot.slane %v1354_v52, 7  ;;  %v530_v15 = vrot.slane %v1339_v24, 4  ;;  %v531_v17 = vrot.slane %v1352_v51, 3 }
  0x49   :  { %385 = vrot.lane.b32.xlu1 %v1079_v43, %s983_s26  ;;  %v480_v43 = vsel %vm72_vm0, %v1352_v51, %v479_v49  ;;  %v247_v8 = vsel %vm87_vm5, %v246_v31, %v245_v62  ;;  %v499_v14 = vsel %vm75_vm1, %v1347_v41, %v498_v7  ;;  %v514_v36 = vrot.slane %v1352_v51, 2  ;;  %v1446_v7 = vld [vmem:[#allocation5 + $0x8] sm:$0xff] }
  0x4a   :  { %v547_v20 = vrot.slane %v1339_v24, 5  ;;  %v548_v21 = vrot.slane %v1352_v51, 4  ;;  %v502_v22 = vrot.slane %v1365_v54, 6  ;;  %v581_v23 = vrot.slane %v1339_v24, 7 }
  0x4b   :  { %v582_v28 = vrot.slane %v1352_v51, 6  ;;  %v1405_v29 = vsel %vm90_vm6, %v248_v11, %v247_v8  ;;  %v489_v1 = vrot.slane %v1386_v12, 3  ;;  %v501_v2 = vsel %vm78_vm2, %v500_v32, %v499_v14 }
  0x4c   :  { %v533_v3 = vrot.slane %v1347_v41, 2  ;;  %v532_v34 = vsel %vm72_vm0, %v531_v17, %v530_v15  ;;  %v516_v35 = vrot.slane %v1347_v41, 1  ;;  %v550_v37 = vrot.slane %v1347_v41, 3 }
  0x4d   :  { %382 = vrot.lane.b32.xlu0 %v1175_v57, %s977_s21  ;;  %v482_v57 = vsel %vm75_vm1, %v481_v53, %v480_v43  ;;  %v549_v42 = vsel %vm72_vm0, %v548_v21, %v547_v20  ;;  %v584_v44 = vrot.slane %v1347_v41, 5  ;;  %v503_v45 = vsel %vm81_vm3, %v502_v22, %v501_v2 }
  0x4e   :  { %v484_v6 = vsel %vm78_vm2, %v483_v55, %v482_v57  ;;  %v535_v10 = vrot.slane %v1354_v52, 1  ;;  %v583_v47 = vsel %vm72_vm0, %v582_v28, %v581_v23  ;;  %v506_v49 = vrot.slane %v1386_v12, 4 }
  0x4f   :  { %388 = vrot.lane.b32.xlu2 %v1152_v38, %s980_s1  ;;  %v1375_v38 = vld [vmem:[#allocation2 + $0x58] sm:$0xff]  ;;  %v486_v13 = vsel %vm81_vm3, %v485_v63, %v484_v6  ;;  %v534_v50 = vsel %vm75_vm1, %v533_v3, %v532_v34  ;;  %v552_v19 = vrot.slane %v1354_v52, 2  ;;  %v551_v25 = vsel %vm75_vm1, %v550_v37, %v549_v42 }
  0x50   :  { %v586_v30 = vrot.slane %v1354_v52, 4  ;;  %v585_v56 = vsel %vm75_vm1, %v584_v44, %v583_v47  ;;  %v564_v58 = vrot.slane %v1339_v24, 6  ;;  %v565_v57 = vrot.slane %v1352_v51, 5 }
  0x51   :  { %394 = vrot.lane.b32.xlu1 %v1131_v26, %s979_s0  ;;  %v487_v26 = vrot.slane %v1375_v38, 4  ;;  %v536_v62 = vsel %vm78_vm2, %v535_v10, %v534_v50  ;;  %v519_v63 = vrot.slane %v1365_v54, 7  ;;  %v554_v6 = vrot.slane %v1365_v54, 1 }
  0x52   :  { %v553_v11 = vsel %vm78_vm2, %v552_v19, %v551_v25  ;;  %v587_v14 = vsel %vm78_vm2, %v586_v30, %v585_v56  ;;  %v567_v15 = vrot.slane %v1347_v41, 4  ;;  %v521_v17 = vrot.slane %v1375_v38, 6 }
  0x53   :  { %v488_v4 = vsel %vm84_vm4, %v487_v26, %v486_v13  ;;  %v588_v26 = vrot.slane %v1365_v54, 3  ;;  %v540_v13 = vrot.slane %v1386_v12, 6  ;;  %v630_v20 = vrot.slane %v1446_v7, 1 }
  0x54   :  { %v490_v48 = vsel %vm87_vm5, %v489_v1, %v488_v4  ;;  %v555_v23 = vsel %vm81_vm3, %v554_v6, %v553_v11  ;;  %v590_v28 = vrot.slane %v1375_v38, 2  ;;  %v1470_v1 = vld [vmem:[#allocation5 + $0x18] sm:$0xff]  ;;  %v523_v3 = vrot.slane %v1386_v12, 5 }
  0x55   :  { %391 = vrot.lane.b32.xlu0 %v1071_v39, %s982_s25  ;;  %v513_v39 = vrot.slane %v1339_v24, 3  ;;  %v589_v4 = vsel %vm81_vm3, %v588_v26, %v587_v14  ;;  %v569_v34 = vrot.slane %v1354_v52, 3  ;;  %v557_v37 = vrot.slane %v1386_v12, 7 }
  0x56   :  { %v556_v44 = vsel %vm84_vm4, %v1375_v38, %v555_v23  ;;  %v591_v10 = vsel %vm84_vm4, %v590_v28, %v589_v4  ;;  %v571_v47 = vrot.slane %v1365_v54, 2  ;;  %v647_v11 = vrot.slane %v1446_v7, 2 }
  0x57   :  { %397 = vrot.lane.b32.xlu2 %v1233_v60, %s981_s24  ;;  %v1407_v60 = vld [vmem:[#allocation2 + $0x78] sm:$0xff]  ;;  %v515_v0 = vsel %vm72_vm0, %v514_v36, %v513_v39  ;;  %v566_v39 = vsel %vm72_vm0, %v565_v57, %v564_v58  ;;  %v1463_v36 = vld [vmem:[#allocation5 + $0x28] sm:$0xff]  ;;  %v558_v30 = vsel %vm87_vm5, %v557_v37, %v556_v44  ;;  %v573_v57 = vrot.slane %v1375_v38, 1 }
  0x58   :  { %v491_v9 = vrot.slane %v1407_v60, 2  ;;  %v508_v53 = vrot.slane %v1407_v60, 3  ;;  %v517_v43 = vsel %vm75_vm1, %v516_v35, %v515_v0  ;;  %v542_v21 = vrot.slane %v1407_v60, 5  ;;  %v1483_v0 = vld [vmem:[#allocation5 + $0x38] sm:$0xff] }
  0x59   :  { %413 = vrot.lane.b32.xlu1 %v1196_v18, %s977_s21  ;;  %v504_v18 = vrot.slane %v1375_v38, 5  ;;  %v518_v8 = vsel %vm78_vm2, %v1354_v52, %v517_v43  ;;  %v632_v42 = vrot.slane %v1463_v36, 7  ;;  %v525_v19 = vrot.slane %v1407_v60, 4 }
  0x5a   :  { %v1441_v31 = vsel %vm90_vm6, %v491_v9, %v490_v48  ;;  %v520_v22 = vsel %vm81_vm3, %v519_v63, %v518_v8  ;;  %v592_v9 = vrot.slane %v1386_v12, 1  ;;  %v1496_v48 = vld [vmem:[#allocation5 + $0x48] sm:$0xff]  ;;  %v634_v43 = vrot.slane %v1483_v0, 6 }
  0x5b   :  { %v505_v55 = vsel %vm84_vm4, %v504_v18, %v503_v45  ;;  %v568_v18 = vsel %vm75_vm1, %v567_v15, %v566_v39  ;;  %v631_v45 = vsel %vm72_vm0, %v1470_v1, %v630_v20  ;;  %v667_v63 = vrot.slane %v1463_v36, 1  ;;  %v1535_v39 = vld [vmem:[#allocation5 + $0x78] sm:$0xff] }
  0x5c   :  { %v507_v32 = vsel %vm87_vm5, %v506_v49, %v505_v55  ;;  %v664_v49 = vrot.slane %v1446_v7, 3  ;;  %v559_v55 = vrot.slane %v1407_v60, 6  ;;  %v633_v56 = vsel %vm75_vm1, %v632_v42, %v631_v45 }
  0x5d   :  { %409 = vrot.lane.b32.xlu0 %v1405_v29, %s985_s28  ;;  %v1475_v2 = vsel %vm90_vm6, %v508_v53, %v507_v32  ;;  %v570_v53 = vsel %vm78_vm2, %v569_v34, %v568_v18  ;;  %v593_v58 = vsel %vm87_vm5, %v592_v9, %v591_v10  ;;  %v648_v26 = vrot.slane %v1470_v1, 1 }
  0x5e   :  { %v572_v6 = vsel %vm81_vm3, %v571_v47, %v570_v53  ;;  %v635_v14 = vsel %vm78_vm2, %v634_v43, %v633_v56  ;;  %v1530_v15 = vsel %vm90_vm6, %v559_v55, %v558_v30  ;;  %v681_v20 = vrot.slane %v1446_v7, 4 }
  0x5f   :  { %416 = vrot.lane.b32.xlu2 %v1288_v61, %s983_s26  ;;  %v538_v61 = vrot.slane %v1375_v38, 7  ;;  %v649_v4 = vsel %vm72_vm0, %v648_v26, %v647_v11  ;;  %v715_v34 = vrot.slane %v1446_v7, 6  ;;  %v642_v18 = vrot.slane %v1535_v39, 2 }
  0x60   :  { %v670_v42 = vrot.slane %v1496_v48, 7  ;;  %v651_v45 = vrot.slane %v1483_v0, 7  ;;  %v698_v43 = vrot.slane %v1446_v7, 5  ;;  %v653_v56 = vrot.slane %v1496_v48, 6 }
  0x61   :  { %422 = vrot.lane.b32.xlu1 %v1250_v16, %s982_s25  ;;  %v537_v16 = vsel %vm81_vm3, %v1365_v54, %v536_v62  ;;  %v636_v62 = vrot.slane %v1496_v48, 5  ;;  %v676_v11 = vrot.slane %v1535_v39, 4  ;;  %vm212_vm7 = vcmask 64512  }
  0x62   :  { %v539_v35 = vsel %vm84_vm4, %v538_v61, %v537_v16  ;;  %v1515_v61 = vld [vmem:[#allocation5 + $0x58] sm:$0xff]  ;;  %v576_v16 = vrot.slane %v1407_v60, 7  ;;  %vm214_vm8 = vcmask 130048   ;;  %vm216_vm9 = vcmask 195584  }
  0x63   :  { %v541_v50 = vsel %vm87_vm5, %v540_v13, %v539_v35  ;;  %v638_v23 = vrot.slane %v1515_v61, 4  ;;  %v716_v35 = vrot.slane %v1470_v1, 5  ;;  %vm218_vm10 = vcmask 261120  }
  0x64   :  { %v1523_v32 = vsel %vm90_vm6, %v542_v21, %v541_v50  ;;  %v1543_v21 = vsel %vm90_vm6, %v1407_v60, %v593_v58  ;;  %v718_v50 = vrot.slane %v1463_v36, 4  ;;  %vm220_vm11 = vcmask 326656  }
  0x65   :  { %419 = vrot.lane.b32.xlu0 %v1267_v40, %s980_s1  ;;  %v522_v40 = vsel %vm84_vm4, %v521_v17, %v520_v22  ;;  %v1533_v17 = vld [vmem:[#allocation5 + $0x68] sm:$0xff]  ;;  %v574_v22 = vsel %vm84_vm4, %v573_v57, %v572_v6  ;;  %v717_v53 = vsel %vm72_vm0, %v716_v35, %v715_v34  ;;  %v464_v6 = vrot.slane %v1352_v51, 7 }
  0x66   :  { %v524_v25 = vsel %vm87_vm5, %v523_v3, %v522_v40  ;;  %v637_v3 = vsel %vm81_vm3, %v636_v62, %v635_v14  ;;  %v640_v37 = vrot.slane %v1533_v17, 3  ;;  %v684_v40 = vrot.slane %v1463_v36, 2 }
  0x67   :  { %425 = vrot.lane.b32.xlu2 %v1326_v5, %s979_s0  ;;  %v665_v5 = vrot.slane %v1470_v1, 2  ;;  %v1526_v13 = vsel %vm90_vm6, %v525_v19, %v524_v25  ;;  %v575_v44 = vsel %vm87_vm5, %v1386_v12, %v574_v22  ;;  %v639_v47 = vsel %vm84_vm4, %v638_v23, %v637_v3 }
  0x68   :  { %v686_v19 = vrot.slane %v1483_v0, 1  ;;  %v699_v25 = vrot.slane %v1470_v1, 4  ;;  %v1576_v30 = vsel %vm90_vm6, %v576_v16, %v575_v44  ;;  %v641_v57 = vsel %vm87_vm5, %v640_v37, %v639_v47 }
  0x69   :  { %493 = vrot.lane.b32.xlu1 %v1441_v31, %s977_s21  ;;  %v666_v8 = vsel %vm72_vm0, %v665_v5, %v664_v49  ;;  %v672_v49 = vrot.slane %v1515_v61, 6  ;;  %v650_v5 = vsel %vm75_vm1, %v1463_v36, %v649_v4  ;;  %v719_v26 = vsel %vm75_vm1, %v718_v50, %v717_v53 }
  0x6a   :  { %v668_v28 = vsel %vm75_vm1, %v667_v63, %v666_v8  ;;  %v652_v62 = vsel %vm78_vm2, %v651_v45, %v650_v5  ;;  %v720_v63 = vrot.slane %v1483_v0, 3  ;;  %v674_v8 = vrot.slane %v1533_v17, 5 }
  0x6b   :  { %v669_v9 = vsel %vm78_vm2, %v1483_v0, %v668_v28  ;;  %v701_v14 = vrot.slane %v1463_v36, 3  ;;  %v700_v22 = vsel %vm72_vm0, %v699_v25, %v698_v43  ;;  %v1598_v51 = vsel %vm90_vm6, %v642_v18, %v641_v57 }
  0x6c   :  { %v671_v55 = vsel %vm81_vm3, %v670_v42, %v669_v9  ;;  %v654_v28 = vsel %vm81_vm3, %v653_v56, %v652_v62  ;;  %v722_v3 = vrot.slane %v1496_v48, 2  ;;  %v466_v4 = vrot.slane %v1347_v41, 6 }
  0x6d   :  { %428 = vrot.lane.b32.xlu0 %v1309_v27, %s981_s24  ;;  %v682_v27 = vrot.slane %v1470_v1, 3  ;;  %v673_v16 = vsel %vm84_vm4, %v672_v49, %v671_v55  ;;  %v689_v34 = vrot.slane %v1515_v61, 7  ;;  %v721_v35 = vsel %vm78_vm2, %v720_v63, %v719_v26 }
  0x6e   :  { %v703_v37 = vrot.slane %v1483_v0, 2  ;;  %v465_v42 = vsel %vm72_vm0, %v464_v6, %v1339_v24  ;;  %v675_v18 = vsel %vm87_vm5, %v674_v8, %v673_v16  ;;  %v702_v9 = vsel %vm75_vm1, %v701_v14, %v700_v22 }
  0x6f   :  { %510 = vrot.lane.b32.xlu2 %v1475_v2, %s983_s26  ;;  %v683_v10 = vsel %vm72_vm0, %v682_v27, %v681_v20  ;;  %v655_v20 = vrot.slane %v1515_v61, 5  ;;  %v724_v45 = vrot.slane %v1515_v61, 1  ;;  %v615_v47 = vrot.slane %v1470_v1, 7 }
  0x70   :  { %v685_v58 = vsel %vm75_vm1, %v684_v40, %v683_v10  ;;  %v657_v40 = vrot.slane %v1533_v17, 4  ;;  %v468_v10 = vrot.slane %v1354_v52, 5  ;;  %v691_v24 = vrot.slane %v1533_v17, 6 }
  0x71   :  { %544 = vrot.lane.b32.xlu1 %v1523_v32, %s982_s25  ;;  %v687_v27 = vsel %vm78_vm2, %v686_v19, %v685_v58  ;;  %v656_v41 = vsel %vm84_vm4, %v655_v20, %v654_v28  ;;  %v723_v49 = vsel %vm81_vm3, %v722_v3, %v721_v35  ;;  %v705_v5 = vrot.slane %v1496_v48, 1 }
  0x72   :  { %v1600_v23 = vpop.permute.xlu2 %175  ;;  %v688_v44 = vsel %vm81_vm3, %v1496_v48, %v687_v27  ;;  %v467_v50 = vsel %vm75_vm1, %v466_v4, %v465_v42  ;;  %v677_v19 = vsel %vm90_vm6, %v676_v11, %v675_v18  ;;  %v659_v53 = vrot.slane %v1535_v39, 3 }
  0x73   :  { %v690_v43 = vsel %vm84_vm4, %v689_v34, %v688_v44  ;;  %v704_v52 = vsel %vm78_vm2, %v703_v37, %v702_v9  ;;  %v658_v25 = vsel %vm87_vm5, %v657_v40, %v656_v41  ;;  %v470_v55 = vrot.slane %v1365_v54, 4 }
  0x74   :  { %v617_v56 = vrot.slane %v1463_v36, 6  ;;  %v693_v58 = vrot.slane %v1535_v39, 5  ;;  %v725_v57 = vsel %vm84_vm4, %v724_v45, %v723_v49  ;;  %v469_v62 = vsel %vm78_vm2, %v468_v10, %v467_v50 }
  0x75   :  { %527 = vrot.lane.b32.xlu0 %v1526_v13, %s980_s1  ;;  %v616_v63 = vsel %vm72_vm0, %v615_v47, %v1446_v7  ;;  %v692_v6 = vsel %vm87_vm5, %v691_v24, %v690_v43  ;;  %v706_v8 = vsel %vm81_vm3, %v705_v5, %v704_v52  ;;  %v660_v11 = vsel %vm90_vm6, %v659_v53, %v658_v25 }
  0x76   :  { %v727_v54 = vrot.slane %v1535_v39, 7  ;;  %v472_v26 = vrot.slane %v1375_v38, 3  ;;  %v619_v14 = vrot.slane %v1483_v0, 5  ;;  %v726_v20 = vsel %vm87_vm5, %v1533_v17, %v725_v57 }
  0x77   :  { %561 = vrot.lane.b32.xlu2 %v1530_v15, %s979_s0  ;;  %v708_v27 = vrot.slane %v1533_v17, 7  ;;  %v471_v22 = vsel %vm81_vm3, %v470_v55, %v469_v62  ;;  %v618_v28 = vsel %vm75_vm1, %v617_v56, %v616_v63  ;;  %v1654_v3 = vsel %vm90_vm6, %v693_v58, %v692_v6 }
  0x78   :  { %v707_v4 = vsel %vm84_vm4, %v1515_v61, %v706_v8  ;;  %v474_v38 = vrot.slane %v1386_v12, 2  ;;  %v621_v34 = vrot.slane %v1496_v48, 4  ;;  %v1662_v35 = vsel %vm90_vm6, %v727_v54, %v726_v20 }
  0x79   :  { %595 = vrot.lane.b32.xlu1 %v1543_v21, %s984_s27  ;;  %v710_v37 = vrot.slane %v1535_v39, 6  ;;  %v473_v42 = vsel %vm84_vm4, %v472_v26, %v471_v22  ;;  %v620_v18 = vsel %vm78_vm2, %v619_v14, %v618_v28  ;;  %v709_v40 = vsel %vm87_vm5, %v708_v27, %v707_v4 }
  0x7a   :  { %v476_v44 = vrot.slane %v1407_v60, 1  ;;  %v623_v12 = vrot.slane %v1515_v61, 3  ;;  %v475_v9 = vsel %vm87_vm5, %v474_v38, %v473_v42  ;;  %v622_v41 = vsel %vm81_vm3, %v621_v34, %v620_v18 }
  0x7b   :  { %v711_v45 = vsel %vm90_vm6, %v710_v37, %v709_v40  ;;  %v625_v10 = vrot.slane %v1533_v17, 2  ;;  %v627_v5 = vrot.slane %v1535_v39, 1  ;;  %v732_v52 = vrot.slane %v1446_v7, 7 }
  0x7c   :  { %v1646_v16 = vpop.permute.xlu2 %192  ;;  %v1679_v47 = vsel %vm90_vm6, %v476_v44, %v475_v9  ;;  %v624_v24 = vsel %vm84_vm4, %v623_v12, %v622_v41  ;;  %v733_v25 = vrot.slane %v1470_v1, 6  ;;  %v737_v63 = vrot.slane %v1483_v0, 4 }
  0x7d   :  { %578 = vrot.lane.b32.xlu0 %v1576_v30, %s981_s24  ;;  %v626_v50 = vsel %vm87_vm5, %v625_v10, %v624_v24  ;;  %vm222_vm12 = vcmask 392192   ;;  %vm224_vm13 = vcmask 457728   ;;  %vm226_vm14 = vcmask 523264  }
  0x7e   :  { %v1690_v43 = vsel %vm90_vm6, %v627_v5, %v626_v50  ;;  %v734_v62 = vsel %vm72_vm0, %v733_v25, %v732_v52 }
  0x7f   :  { %644 = vrot.lane.b32.xlu2 %v1598_v51, %s977_s21 }
  0x81   :  { %678 = vrot.lane.b32.xlu1 %v677_v19, %s980_s1 }
  0x85   :  { %661 = vrot.lane.b32.xlu0 %v660_v11, %s983_s26 }
  0x86   :  { %v283_v60 = vpop.permute.xlu2 %282 }
  0x87   :  { %695 = vrot.lane.b32.xlu2 %v1654_v3, %s982_s25 }
  0x89   :  { %729 = vrot.lane.b32.xlu1 %v1662_v35, %s981_s24 }
  0x8b   :  { %v142_v49 = vpop.permute.xlu1 %141 }
  0x8d   :  { %712 = vrot.lane.b32.xlu0 %v711_v45, %s979_s0 }
  0x8e   :  { %v108_v53 = vpop.permute.xlu0 %107 }
  0x8f   :  { %758 = vrot.lane.b32.xlu2 %v1679_v47, %s985_s28  ;;  %v213_v58 = vsel %vm212_vm7, %v1335_v46, %v108_v53 }
  0x90   :  { %v334_v55 = vpop.permute.xlu2 %333 }
  0x91   :  { %762 = vrot.lane.b32.xlu1 %v1475_v2, %s977_s21  ;;  %v735_v2 = vrot.slane %v1463_v36, 5  ;;  %v739_v36 = vrot.slane %v1496_v48, 3 }
  0x95   :  { %789 = vrot.lane.b32.xlu0 %v1690_v43, %s985_s28 }
  0x96   :  { %v159_v56 = vpop.permute.xlu1 %158 }
  0x97   :  { %793 = vrot.lane.b32.xlu2 %v660_v11, %s977_s21  ;;  %v741_v11 = vrot.slane %v1515_v61, 2 }
  0x99   :  { %796 = vrot.lane.b32.xlu1 %v677_v19, %s983_s26  ;;  %v125_v57 = vpop.permute.xlu0 %124  ;;  %v736_v19 = vsel %vm75_vm1, %v735_v2, %v734_v62 }
  0x9a   :  { %v215_v7 = vsel %vm214_vm8, %v213_v58, %v125_v57  ;;  %v738_v6 = vsel %vm78_vm2, %v737_v63, %v736_v19 }
  0x9b   :  { %v217_v1 = vsel %vm216_vm9, %v215_v7, %v142_v49 }
  0x9c   :  { %v219_v46 = vsel %vm218_vm10, %v217_v1, %v159_v56 }
  0x9d   :  { %765 = vrot.lane.b32.xlu0 %v1526_v13, %s983_s26  ;;  %v221_v13 = vsel %vm220_vm11, %v219_v46, %v1600_v23 }
  0x9e   :  { %v223_v54 = vsel %vm222_vm12, %v221_v13, %v1646_v16 }
  0x9f   :  { %768 = vrot.lane.b32.xlu2 %v1523_v32, %s980_s1  ;;  %v740_v32 = vsel %vm81_vm3, %v739_v36, %v738_v6 }
  0xa0   :  { %v266_v0 = vpop.permute.xlu1 %265  ;;  %v742_v14 = vsel %vm84_vm4, %v741_v11, %v740_v32 }
  0xa1   :  { %v379_v8 = vpop.permute.xlu2 %378  ;;  %771 = vrot.lane.b32.xlu1 %v1530_v15, %s982_s25  ;;  %v743_v15 = vrot.slane %v1533_v17, 1  ;;  %v370_v17 = vsel %vm212_vm7, %v1405_v29, %v266_v0 }
  0xa2   :  { %v371_v22 = vsel %vm214_vm8, %v370_v17, %v283_v60  ;;  %v400_v42 = vsel %vm212_vm7, %v379_v8, %v1099_v59 }
  0xa3   :  { %v744_v23 = vsel %vm87_vm5, %v743_v15, %v742_v14 }
  0xa4   :  { %v210_v48 = vpop.permute.xlu0 %209  ;;  %v745_v16 = vsel %vm90_vm6, %v1535_v39, %v744_v23 }
  0xa5   :  { %799 = vrot.lane.b32.xlu0 %v1654_v3, %s980_s1  ;;  %v225_v26 = vsel %vm224_vm13, %v223_v54, %v210_v48 }
  0xa6   :  { %227 = vst.msk [vmem:[#allocation7] sm:$0xff] %vm226_vm14, %v225_v26 }
  0xa7   :  { %802 = vrot.lane.b32.xlu2 %v711_v45, %s982_s25 }
  0xa9   :  { %v389_v61 = vpop.permute.xlu2 %388  ;;  %805 = vrot.lane.b32.xlu1 %v1662_v35, %s979_s0 }
  0xab   :  { %v317_v20 = vpop.permute.xlu1 %316 }
  0xad   :  { %774 = vrot.lane.b32.xlu0 %v1576_v30, %s979_s0 }
  0xaf   :  { %746 = vrot.lane.b32.xlu2 %v745_v16, %s984_s27  ;;  %v300_v27 = vpop.permute.xlu0 %299 }
  0xb0   :  { %v372_v28 = vsel %vm216_vm9, %v371_v22, %v300_v27 }
  0xb1   :  { %v398_v3 = vpop.permute.xlu2 %397  ;;  %808 = vrot.lane.b32.xlu1 %v745_v16, %s981_s24  ;;  %v373_v38 = vsel %vm218_vm10, %v372_v28, %v317_v20 }
  0xb2   :  { %v374_v29 = vsel %vm220_vm11, %v373_v38, %v334_v55 }
  0xb3   :  { %v368_v4 = vpop.permute.xlu1 %367 }
  0xb5   :  { %777 = vrot.lane.b32.xlu0 %v1543_v21, %s981_s24 }
  0xb7   :  { %v351_v39 = vpop.permute.xlu0 %350 }
  0xb8   :  { %v375_v30 = vsel %vm222_vm12, %v374_v29, %v351_v39 }
  0xb9   :  { %v376_v34 = vsel %vm224_vm13, %v375_v30, %v368_v4  ;;  %v417_v35 = vpop.permute.xlu2 %416 }
  0xba   :  { %377 = vst.msk [vmem:[#allocation8] sm:$0xff] %vm226_vm14, %v376_v34 }
  0xbb   :  { %v386_v37 = vpop.permute.xlu1 %385 }
  0xbf   :  { %v383_v18 = vpop.permute.xlu0 %382 }
  0xc0   :  { %v401_v40 = vsel %vm214_vm8, %v400_v42, %v383_v18 }
  0xc1   :  { %v426_v44 = vpop.permute.xlu2 %425  ;;  %v402_v21 = vsel %vm216_vm9, %v401_v40, %v386_v37 }
  0xc2   :  { %v403_v41 = vsel %vm218_vm10, %v402_v21, %v389_v61 }
  0xc3   :  { %v395_v12 = vpop.permute.xlu1 %394 }
  0xc7   :  { %v392_v9 = vpop.permute.xlu0 %391 }
  0xc8   :  { %v404_v45 = vsel %vm220_vm11, %v403_v41, %v392_v9 }
  0xc9   :  { %v405_v10 = vsel %vm222_vm12, %v404_v45, %v395_v12  ;;  %v511_v24 = vpop.permute.xlu2 %510 }
  0xca   :  { %v406_v60 = vsel %vm224_vm13, %v405_v10, %v398_v3 }
  0xcb   :  { %408 = vst.msk [vmem:[#allocation7 + $0x8] sm:$0xff] %vm226_vm14, %v406_v60  ;;  %v414_v59 = vpop.permute.xlu1 %413 }
  0xcf   :  { %v410_v49 = vpop.permute.xlu0 %409 }
  0xd0   :  { %v431_v50 = vsel %vm212_vm7, %v410_v49, %v1208_v33 }
  0xd1   :  { %v562_v5 = vpop.permute.xlu2 %561  ;;  %v432_v52 = vsel %vm214_vm8, %v431_v50, %v414_v59 }
  0xd2   :  { %v433_v55 = vsel %vm216_vm9, %v432_v52, %v417_v35 }
  0xd3   :  { %v423_v53 = vpop.permute.xlu1 %422 }
  0xd7   :  { %v420_v25 = vpop.permute.xlu0 %419 }
  0xd8   :  { %v434_v56 = vsel %vm218_vm10, %v433_v55, %v420_v25 }
  0xd9   :  { %v645_v2 = vpop.permute.xlu2 %644  ;;  %v435_v57 = vsel %vm220_vm11, %v434_v56, %v423_v53 }
  0xda   :  { %v436_v7 = vsel %vm222_vm12, %v435_v57, %v426_v44  ;;  %v749_v23 = vsel %vm212_vm7, %v1690_v43, %v645_v2 }
  0xdb   :  { %v494_v58 = vpop.permute.xlu1 %493 }
  0xdc   :  { %v598_v19 = vsel %vm212_vm7, %v1679_v47, %v494_v58 }
  0xdd   :  { %v599_v36 = vsel %vm214_vm8, %v598_v19, %v511_v24 }
  0xdf   :  { %v429_v62 = vpop.permute.xlu0 %428 }
  0xe0   :  { %v437_v1 = vsel %vm224_vm13, %v436_v7, %v429_v62 }
  0xe1   :  { %439 = vst.msk [vmem:[#allocation8 + $0x8] sm:$0xff] %vm226_vm14, %v437_v1  ;;  %v696_v33 = vpop.permute.xlu2 %695 }
  0xe3   :  { %v545_v63 = vpop.permute.xlu1 %544 }
  0xe7   :  { %v528_v46 = vpop.permute.xlu0 %527 }
  0xe8   :  { %v600_v6 = vsel %vm216_vm9, %v599_v36, %v528_v46 }
  0xe9   :  { %v759_v8 = vpop.permute.xlu2 %758  ;;  %v601_v13 = vsel %vm218_vm10, %v600_v6, %v545_v63 }
  0xea   :  { %v602_v32 = vsel %vm220_vm11, %v601_v13, %v562_v5  ;;  %v780_v40 = vsel %vm212_vm7, %v759_v8, %v1441_v31 }
  0xeb   :  { %v596_v0 = vpop.permute.xlu1 %595 }
  0xef   :  { %v579_v11 = vpop.permute.xlu0 %578 }
  0xf0   :  { %v603_v48 = vsel %vm222_vm12, %v602_v32, %v579_v11 }
  0xf1   :  { %v604_v54 = vsel %vm224_vm13, %v603_v48, %v596_v0  ;;  %v794_v15 = vpop.permute.xlu2 %793 }
  0xf2   :  { %606 = vst.msk [vmem:[#allocation7 + $0x10] sm:$0xff] %vm226_vm14, %v604_v54 }
  0xf3   :  { %v679_v47 = vpop.permute.xlu1 %678 }
  0xf7   :  { %v662_v26 = vpop.permute.xlu0 %661 }
  0xf8   :  { %v750_v20 = vsel %vm214_vm8, %v749_v23, %v662_v26 }
  0xf9   :  { %v769_v14 = vpop.permute.xlu2 %768  ;;  %v751_v27 = vsel %vm216_vm9, %v750_v20, %v679_v47 }
  0xfa   :  { %v752_v28 = vsel %vm218_vm10, %v751_v27, %v696_v33 }
  0xfb   :  { %v730_v61 = vpop.permute.xlu1 %729 }
  0xff   :  { %v713_v16 = vpop.permute.xlu0 %712 }
 0x100   :  { %v753_v3 = vsel %vm220_vm11, %v752_v28, %v713_v16 }
 0x101   :  { %v803_v17 = vpop.permute.xlu2 %802  ;;  %v754_v38 = vsel %vm222_vm12, %v753_v3, %v730_v61 }
 0x103   :  { %v763_v22 = vpop.permute.xlu1 %762 }
 0x104   :  { %v781_v9 = vsel %vm214_vm8, %v780_v40, %v763_v22 }
 0x107   :  { %v790_v4 = vpop.permute.xlu0 %789 }
 0x108   :  { %v811_v37 = vsel %vm212_vm7, %v790_v4, %v1598_v51 }
 0x109   :  { %v747_v29 = vpop.permute.xlu2 %746  ;;  %v812_v18 = vsel %vm214_vm8, %v811_v37, %v794_v15 }
 0x10a   :  { %v755_v39 = vsel %vm224_vm13, %v754_v38, %v747_v29 }
 0x10b   :  { %757 = vst.msk [vmem:[#allocation8 + $0x10] sm:$0xff] %vm226_vm14, %v755_v39  ;;  %v797_v43 = vpop.permute.xlu1 %796 }
 0x10c   :  { %v813_v44 = vsel %vm216_vm9, %v812_v18, %v797_v43 }
 0x10f   :  { %v766_v30 = vpop.permute.xlu0 %765 }
 0x110   :  { %v782_v51 = vsel %vm216_vm9, %v781_v9, %v766_v30 }
 0x111   :  { %v783_v24 = vsel %vm218_vm10, %v782_v51, %v769_v14 }
 0x113   :  { %v772_v34 = vpop.permute.xlu1 %771 }
 0x114   :  { %v784_v60 = vsel %vm220_vm11, %v783_v24, %v772_v34 }
 0x117   :  { %v800_v35 = vpop.permute.xlu0 %799 }
 0x118   :  { %v814_v12 = vsel %vm218_vm10, %v813_v44, %v800_v35 }
 0x119   :  { %v815_v41 = vsel %vm220_vm11, %v814_v12, %v803_v17 }
 0x11b   :  { %v806_v42 = vpop.permute.xlu1 %805 }
 0x11c   :  { %v816_v45 = vsel %vm222_vm12, %v815_v41, %v806_v42 }
 0x11f   :  { %v775_v21 = vpop.permute.xlu0 %774 }
 0x120   :  { %v785_v59 = vsel %vm222_vm12, %v784_v60, %v775_v21 }
 0x123   :  { %v809_v31 = vpop.permute.xlu1 %808 }
 0x124   :  { %v817_v10 = vsel %vm224_vm13, %v816_v45, %v809_v31 }
 0x125   :  { %819 = vst.msk [vmem:[#allocation8 + $0x18] sm:$0xff] %vm226_vm14, %v817_v10 }
 0x126   :  { %845 = dma.vmem_to_hbm [thread:$0]  %s838_s30, 512, %s840_s6, [#allocation9], %s976_s20, %s976_s20, %s977_s21  }
 0x127   :  { %v778_v49 = vpop.permute.xlu0 %777 }
 0x128   :  { %v786_v5 = vsel %vm224_vm13, %v785_v59, %v778_v49 }
 0x129   :  { %788 = vst.msk [vmem:[#allocation7 + $0x18] sm:$0xff] %vm226_vm14, %v786_v5 }
 0x12a   :  { %832 = dma.vmem_to_hbm [thread:$0]  %s825_s8, 512, %s827_s11, [#allocation4], %s976_s20, %s976_s20, %s977_s21  }
 0x12b   :  { %971 = dma.done.wait [#allocation4], 512  }
 0x12c   :  { %972 = vsyncadd [#allocation4], 4294966784 }
 0x12d   :  { %973 = dma.done.wait [#allocation9], 512  }
 0x12e   :  { %974 = vsyncadd [#allocation9], 4294966784 }
 0x12f   :  { %854 = vsyncpa [#allocation3], 1 }
 0x130   :  { %855 = vsyncpa [#allocation6], 1 }
 0x131   :  { %856 = vsyncpa [#allocation4], 1 }
 0x132   :  { %857 = vsyncpa [#allocation9], 1 }

</bundles_post_ra>
